<compile_context>
chip_gen: v7x
topology: tpu7x:2x2x1
jax: 0.10.0
libtpu: 0.0.40
codegen_flags: <defaults>
</compile_context>

<pallas_src>
import jax
import jax.numpy as jnp
from jax import lax
from jax.experimental import pallas as pl
from jax.experimental.pallas import tpu as pltpu

EPS = 1e-5


def _make_kernel(H, W):
    HW = H * W

    def kernel(x_ref, w1_ref, w2_ref, p_ref, o_ref):
        CP = x_ref.shape[1]                       # channels padded to sublane granule
        x = x_ref[0]                              # (CP, HW) f32, lane-dense

        # --- tap geometry shared by both convs: lane shift + zero-padding mask ---
        lane = lax.broadcasted_iota(jnp.int32, (1, HW), 1)
        if W & (W - 1) == 0:
            w_idx = jnp.bitwise_and(lane, W - 1)
        else:
            w_idx = lax.rem(lane, W)

        taps = []
        for kh in range(3):
            for kw in range(3):
                dh, dw = kh - 1, kw - 1
                off = dh * W + dw                 # shifted[p] must read x[p + off]
                conds = []
                if dh < 0:
                    conds.append(lane >= (-dh) * W)
                if dh > 0:
                    conds.append(lane < (H - dh) * W)
                if dw < 0:
                    conds.append(w_idx >= -dw)
                if dw > 0:
                    conds.append(w_idx < W - dw)
                mask = None
                if conds:
                    mask = conds[0]
                    for c in conds[1:]:
                        mask = mask & c
                taps.append(((-off) % HW, mask))

        def conv3x3(inp, w_ref):
            # inp: (CP, HW); w_ref: (9, CP, CP) with tap t = kh*3 + kw holding (Cout, Cin).
            acc = jnp.zeros((CP, HW), jnp.float32)
            for t, (shift, mask) in enumerate(taps):
                shifted = inp if shift == 0 else pltpu.roll(inp, shift, axis=1)
                if mask is not None:
                    shifted = jnp.where(mask, shifted, 0.0)
                acc = acc + jnp.dot(w_ref[t], shifted,
                                    preferred_element_type=jnp.float32,
                                    precision=lax.Precision.HIGHEST)
            return acc

        def inorm(y, gamma, beta):
            # Per-channel biased stats over the lane (H*W) axis; two-pass for stability.
            inv_n = 1.0 / float(HW)
            mu = jnp.sum(y, axis=1, keepdims=True) * inv_n
            d = y - mu
            var = jnp.sum(d * d, axis=1, keepdims=True) * inv_n
            return d * lax.rsqrt(var + EPS) * gamma + beta

        g1, b1 = p_ref[:, 0:1], p_ref[:, 1:2]
        g2, b2 = p_ref[:, 2:3], p_ref[:, 3:4]

        h = jnp.maximum(inorm(conv3x3(x, w1_ref), g1, b1), 0.0)   # conv1 + IN1 + ReLU
        h2 = inorm(conv3x3(h, w2_ref), g2, b2)                    # conv2 + IN2
        o_ref[0] = x + h2                                         # residual, full-lane store

    return kernel


def residual_block(x_nchw, w1_hwio, g1, b1, w2_hwio, g2, b2):
    """x_nchw: (B, C, H, W) f32. w*: (3, 3, Cin, Cout) HWIO. g*/b*: (C,)."""
    B, C, H, W = x_nchw.shape
    Cin, Cout = w1_hwio.shape[2], w1_hwio.shape[3]
    assert C == Cin and Cout == C, "residual add requires dim_in == dim_out"

    HW = H * W
    CP = ((C + 7) // 8) * 8                        # pad channels to 8-sublane granule

    def pad_c(a, axis):
        pad = [(0, 0)] * a.ndim
        pad[axis] = (0, CP - C)
        return jnp.pad(a, pad)

    # NCHW -> (B, C, H*W) is a pure reshape (row-major h*W + w), then channel-pad.
    x = pad_c(x_nchw.reshape(B, C, HW).astype(jnp.float32), 1)          # (B, CP, HW)

    def prep_w(w):
        # HWIO (3,3,Cin,Cout) -> (tap, Cout_p, Cin_p) so each tap is a ready (Cout,Cin) tile.
        w = jnp.transpose(w.astype(jnp.float32), (0, 1, 3, 2))          # (3,3,Cout,Cin)
        w = jnp.pad(w, ((0, 0), (0, 0), (0, CP - C), (0, CP - C)))
        return w.reshape(9, CP, CP)

    w1k, w2k = prep_w(w1_hwio), prep_w(w2_hwio)
    params = pad_c(jnp.stack([g1, b1, g2, b2], axis=1).astype(jnp.float32), 0)  # (CP, 4)

    out = pl.pallas_call(
        _make_kernel(H, W),
        out_shape=jax.ShapeDtypeStruct((B, CP, HW), jnp.float32),
        grid_spec=pltpu.PrefetchScalarGridSpec(
            num_scalar_prefetch=0,
            grid=(B,),
            in_specs=[
                pl.BlockSpec((1, CP, HW), lambda b: (b, 0, 0)),
                pl.BlockSpec((9, CP, CP), lambda b: (0, 0, 0)),
                pl.BlockSpec((9, CP, CP), lambda b: (0, 0, 0)),
                pl.BlockSpec((CP, 4), lambda b: (0, 0)),
            ],
            out_specs=pl.BlockSpec((1, CP, HW), lambda b: (b, 0, 0)),
        ),
        compiler_params=pltpu.CompilerParams(dimension_semantics=("parallel",)),
    )(x, w1k, w2k, params)

    return out[:, :C, :].reshape(B, C, H, W)


def ref_forward(x_nchw, w1, g1, b1, w2, g2, b2):
    """Pure-JAX reference matching the PyTorch module's forward."""
    x = jnp.transpose(x_nchw, (0, 2, 3, 1))

    def conv(inp, w):
        return jax.lax.conv_general_dilated(
            inp, w, window_strides=(1, 1), padding="SAME",
            dimension_numbers=("NHWC", "HWIO", "NHWC"),
            precision=jax.lax.Precision.HIGHEST)

    def inorm(y, g, b):
        mu = jnp.mean(y, axis=(1, 2), keepdims=True)
        var = jnp.mean(jnp.square(y - mu), axis=(1, 2), keepdims=True)
        return (y - mu) / jnp.sqrt(var + EPS) * g.reshape(1, 1, 1, -1) + b.reshape(1, 1, 1, -1)

    h = jax.nn.relu(inorm(conv(x, w1), g1, b1))
    h = inorm(conv(h, w2), g2, b2)
    return jnp.transpose(x + h, (0, 3, 1, 2))


if __name__ == "__main__":
    B, C, H, W = 2, 4, 16, 16          # dim_in == dim_out == 4

    key = jax.random.PRNGKey(0)
    ks = jax.random.split(key, 7)
    x = jax.random.normal(ks[0], (B, C, H, W), jnp.float32)
    w1 = 0.2 * jax.random.normal(ks[1], (3, 3, C, C), jnp.float32)   # HWIO
    w2 = 0.2 * jax.random.normal(ks[2], (3, 3, C, C), jnp.float32)   # HWIO
    g1 = 1.0 + 0.1 * jax.random.normal(ks[3], (C,), jnp.float32)
    b1 = 0.1 * jax.random.normal(ks[4], (C,), jnp.float32)
    g2 = 1.0 + 0.1 * jax.random.normal(ks[5], (C,), jnp.float32)
    b2 = 0.1 * jax.random.normal(ks[6], (C,), jnp.float32)

    out = jax.block_until_ready(residual_block(x, w1, g1, b1, w2, g2, b2))
    ref = ref_forward(x, w1, g1, b1, w2, g2, b2)
    err = float(jnp.max(jnp.abs(out - ref)))
    assert out.shape == x.shape, (out.shape, x.shape)
    if err < 1e-3:
        print("KERNEL_OK")
    else:
        print(f"MISMATCH max_abs_err={err}")
</pallas_src>

<mosaic_0001>
module attributes {stable_mosaic.version = 11 : i64} {
  func.func @kernel(%arg0: i32, %arg1: memref<1x8x256xf32, #tpu.memory_space<vmem>>, %arg2: memref<9x8x8xf32, #tpu.memory_space<vmem>>, %arg3: memref<9x8x8xf32, #tpu.memory_space<vmem>>, %arg4: memref<8x4xf32, #tpu.memory_space<vmem>>, %arg5: memref<1x8x256xf32, #tpu.memory_space<vmem>>) attributes {dimension_semantics = [#tpu.dimension_semantics<parallel>], iteration_bounds = array<i64: 2>, scalar_prefetch = 0 : i64, scratch_operands = 0 : i64, tpu.core_type = #tpu.core_type<tc>, window_params = [{transform_indices = @transform_0, window_bounds = array<i64: 1, 8, 256>}, {pipeline_mode = #tpu.pipeline_mode<synchronous>, transform_indices = @transform_1, window_bounds = array<i64: 9, 8, 8>}, {pipeline_mode = #tpu.pipeline_mode<synchronous>, transform_indices = @transform_2, window_bounds = array<i64: 9, 8, 8>}, {pipeline_mode = #tpu.pipeline_mode<synchronous>, transform_indices = @transform_3, window_bounds = array<i64: 8, 4>}, {transform_indices = @transform_4, window_bounds = array<i64: 1, 8, 256>}]} {
    %c0 = arith.constant 0 : index
    %c0_0 = arith.constant 0 : index
    %c0_1 = arith.constant 0 : index
    %0 = vector.load %arg1[%c0, %c0_0, %c0_1] : memref<1x8x256xf32, #tpu.memory_space<vmem>>, vector<1x8x256xf32>
    %1 = vector.shape_cast %0 : vector<1x8x256xf32> to vector<8x256xf32>
    %2 = tpu.iota {dimensions = array<i32: 1>} : vector<1x256xi32>
    %c15_i32 = arith.constant 15 : i32
    %3 = vector.broadcast %c15_i32 : i32 to vector<1x256xi32>
    %4 = arith.andi %2, %3 : vector<1x256xi32>
    %c16_i32 = arith.constant 16 : i32
    %5 = vector.broadcast %c16_i32 : i32 to vector<1x256xi32>
    %6 = arith.cmpi sge, %2, %5 : vector<1x256xi32>
    %c1_i32 = arith.constant 1 : i32
    %7 = vector.broadcast %c1_i32 : i32 to vector<1x256xi32>
    %8 = arith.cmpi sge, %4, %7 : vector<1x256xi32>
    %9 = arith.andi %6, %8 : vector<1x256xi1>
    %c16_i32_2 = arith.constant 16 : i32
    %10 = vector.broadcast %c16_i32_2 : i32 to vector<1x256xi32>
    %11 = arith.cmpi sge, %2, %10 : vector<1x256xi32>
    %c16_i32_3 = arith.constant 16 : i32
    %12 = vector.broadcast %c16_i32_3 : i32 to vector<1x256xi32>
    %13 = arith.cmpi sge, %2, %12 : vector<1x256xi32>
    %c15_i32_4 = arith.constant 15 : i32
    %14 = vector.broadcast %c15_i32_4 : i32 to vector<1x256xi32>
    %15 = arith.cmpi slt, %4, %14 : vector<1x256xi32>
    %16 = arith.andi %13, %15 : vector<1x256xi1>
    %c1_i32_5 = arith.constant 1 : i32
    %17 = vector.broadcast %c1_i32_5 : i32 to vector<1x256xi32>
    %18 = arith.cmpi sge, %4, %17 : vector<1x256xi32>
    %c15_i32_6 = arith.constant 15 : i32
    %19 = vector.broadcast %c15_i32_6 : i32 to vector<1x256xi32>
    %20 = arith.cmpi slt, %4, %19 : vector<1x256xi32>
    %c240_i32 = arith.constant 240 : i32
    %21 = vector.broadcast %c240_i32 : i32 to vector<1x256xi32>
    %22 = arith.cmpi slt, %2, %21 : vector<1x256xi32>
    %c1_i32_7 = arith.constant 1 : i32
    %23 = vector.broadcast %c1_i32_7 : i32 to vector<1x256xi32>
    %24 = arith.cmpi sge, %4, %23 : vector<1x256xi32>
    %25 = arith.andi %22, %24 : vector<1x256xi1>
    %c240_i32_8 = arith.constant 240 : i32
    %26 = vector.broadcast %c240_i32_8 : i32 to vector<1x256xi32>
    %27 = arith.cmpi slt, %2, %26 : vector<1x256xi32>
    %c240_i32_9 = arith.constant 240 : i32
    %28 = vector.broadcast %c240_i32_9 : i32 to vector<1x256xi32>
    %29 = arith.cmpi slt, %2, %28 : vector<1x256xi32>
    %c15_i32_10 = arith.constant 15 : i32
    %30 = vector.broadcast %c15_i32_10 : i32 to vector<1x256xi32>
    %31 = arith.cmpi slt, %4, %30 : vector<1x256xi32>
    %32 = arith.andi %29, %31 : vector<1x256xi1>
    %c0_11 = arith.constant 0 : index
    %c0_12 = arith.constant 0 : index
    %33 = vector.load %arg4[%c0_11, %c0_12] : memref<8x4xf32, #tpu.memory_space<vmem>>, vector<8x1xf32>
    %c0_13 = arith.constant 0 : index
    %c1 = arith.constant 1 : index
    %34 = vector.load %arg4[%c0_13, %c1] : memref<8x4xf32, #tpu.memory_space<vmem>>, vector<8x1xf32>
    %c0_14 = arith.constant 0 : index
    %c2 = arith.constant 2 : index
    %35 = vector.load %arg4[%c0_14, %c2] : memref<8x4xf32, #tpu.memory_space<vmem>>, vector<8x1xf32>
    %c0_15 = arith.constant 0 : index
    %c3 = arith.constant 3 : index
    %36 = vector.load %arg4[%c0_15, %c3] : memref<8x4xf32, #tpu.memory_space<vmem>>, vector<8x1xf32>
    %cst = arith.constant 0.000000e+00 : f32
    %37 = vector.broadcast %cst : f32 to vector<8x256xf32>
    %c17_i32 = arith.constant 17 : i32
    %38 = tpu.dynamic_rotate %1 by %c17_i32 dim 1 : vector<8x256xf32>, i32 -> vector<8x256xf32>
    %cst_16 = arith.constant 0.000000e+00 : f32
    %39 = vector.shape_cast %9 : vector<1x256xi1> to vector<1x256xi1>
    %40 = vector.broadcast %39 : vector<1x256xi1> to vector<8x256xi1>
    %41 = vector.broadcast %cst_16 : f32 to vector<8x256xf32>
    %42 = arith.select %40, %38, %41 : vector<8x256xi1>, vector<8x256xf32>
    %c0_17 = arith.constant 0 : index
    %c0_18 = arith.constant 0 : index
    %c0_19 = arith.constant 0 : index
    %43 = vector.load %arg2[%c0_17, %c0_18, %c0_19] : memref<9x8x8xf32, #tpu.memory_space<vmem>>, vector<1x8x8xf32>
    %44 = vector.shape_cast %43 : vector<1x8x8xf32> to vector<8x8xf32>
    %cst_20 = arith.constant dense<0.000000e+00> : vector<8x256xf32>
    %45 = tpu.matmul %44, %42, %cst_20 {dimension_numbers = #tpu.dot_dimension_numbers<[1], [0], [0], [1], [0, 0, 1, 1], [], []>, precision = #tpu.contract_precision<fp32>} : vector<8x8xf32>, vector<8x256xf32>, vector<8x256xf32> -> vector<8x256xf32>
    %46 = arith.addf %37, %45 : vector<8x256xf32>
    %c16_i32_21 = arith.constant 16 : i32
    %47 = tpu.dynamic_rotate %1 by %c16_i32_21 dim 1 : vector<8x256xf32>, i32 -> vector<8x256xf32>
    %cst_22 = arith.constant 0.000000e+00 : f32
    %48 = vector.shape_cast %11 : vector<1x256xi1> to vector<1x256xi1>
    %49 = vector.broadcast %48 : vector<1x256xi1> to vector<8x256xi1>
    %50 = vector.broadcast %cst_22 : f32 to vector<8x256xf32>
    %51 = arith.select %49, %47, %50 : vector<8x256xi1>, vector<8x256xf32>
    %c1_23 = arith.constant 1 : index
    %c0_24 = arith.constant 0 : index
    %c0_25 = arith.constant 0 : index
    %52 = vector.load %arg2[%c1_23, %c0_24, %c0_25] : memref<9x8x8xf32, #tpu.memory_space<vmem>>, vector<1x8x8xf32>
    %53 = vector.shape_cast %52 : vector<1x8x8xf32> to vector<8x8xf32>
    %cst_26 = arith.constant dense<0.000000e+00> : vector<8x256xf32>
    %54 = tpu.matmul %53, %51, %cst_26 {dimension_numbers = #tpu.dot_dimension_numbers<[1], [0], [0], [1], [0, 0, 1, 1], [], []>, precision = #tpu.contract_precision<fp32>} : vector<8x8xf32>, vector<8x256xf32>, vector<8x256xf32> -> vector<8x256xf32>
    %55 = arith.addf %46, %54 : vector<8x256xf32>
    %c15_i32_27 = arith.constant 15 : i32
    %56 = tpu.dynamic_rotate %1 by %c15_i32_27 dim 1 : vector<8x256xf32>, i32 -> vector<8x256xf32>
    %cst_28 = arith.constant 0.000000e+00 : f32
    %57 = vector.shape_cast %16 : vector<1x256xi1> to vector<1x256xi1>
    %58 = vector.broadcast %57 : vector<1x256xi1> to vector<8x256xi1>
    %59 = vector.broadcast %cst_28 : f32 to vector<8x256xf32>
    %60 = arith.select %58, %56, %59 : vector<8x256xi1>, vector<8x256xf32>
    %c2_29 = arith.constant 2 : index
    %c0_30 = arith.constant 0 : index
    %c0_31 = arith.constant 0 : index
    %61 = vector.load %arg2[%c2_29, %c0_30, %c0_31] : memref<9x8x8xf32, #tpu.memory_space<vmem>>, vector<1x8x8xf32>
    %62 = vector.shape_cast %61 : vector<1x8x8xf32> to vector<8x8xf32>
    %cst_32 = arith.constant dense<0.000000e+00> : vector<8x256xf32>
    %63 = tpu.matmul %62, %60, %cst_32 {dimension_numbers = #tpu.dot_dimension_numbers<[1], [0], [0], [1], [0, 0, 1, 1], [], []>, precision = #tpu.contract_precision<fp32>} : vector<8x8xf32>, vector<8x256xf32>, vector<8x256xf32> -> vector<8x256xf32>
    %64 = arith.addf %55, %63 : vector<8x256xf32>
    %c1_i32_33 = arith.constant 1 : i32
    %65 = tpu.dynamic_rotate %1 by %c1_i32_33 dim 1 : vector<8x256xf32>, i32 -> vector<8x256xf32>
    %cst_34 = arith.constant 0.000000e+00 : f32
    %66 = vector.shape_cast %18 : vector<1x256xi1> to vector<1x256xi1>
    %67 = vector.broadcast %66 : vector<1x256xi1> to vector<8x256xi1>
    %68 = vector.broadcast %cst_34 : f32 to vector<8x256xf32>
    %69 = arith.select %67, %65, %68 : vector<8x256xi1>, vector<8x256xf32>
    %c3_35 = arith.constant 3 : index
    %c0_36 = arith.constant 0 : index
    %c0_37 = arith.constant 0 : index
    %70 = vector.load %arg2[%c3_35, %c0_36, %c0_37] : memref<9x8x8xf32, #tpu.memory_space<vmem>>, vector<1x8x8xf32>
    %71 = vector.shape_cast %70 : vector<1x8x8xf32> to vector<8x8xf32>
    %cst_38 = arith.constant dense<0.000000e+00> : vector<8x256xf32>
    %72 = tpu.matmul %71, %69, %cst_38 {dimension_numbers = #tpu.dot_dimension_numbers<[1], [0], [0], [1], [0, 0, 1, 1], [], []>, precision = #tpu.contract_precision<fp32>} : vector<8x8xf32>, vector<8x256xf32>, vector<8x256xf32> -> vector<8x256xf32>
    %73 = arith.addf %64, %72 : vector<8x256xf32>
    %c4 = arith.constant 4 : index
    %c0_39 = arith.constant 0 : index
    %c0_40 = arith.constant 0 : index
    %74 = vector.load %arg2[%c4, %c0_39, %c0_40] : memref<9x8x8xf32, #tpu.memory_space<vmem>>, vector<1x8x8xf32>
    %75 = vector.shape_cast %74 : vector<1x8x8xf32> to vector<8x8xf32>
    %cst_41 = arith.constant dense<0.000000e+00> : vector<8x256xf32>
    %76 = tpu.matmul %75, %1, %cst_41 {dimension_numbers = #tpu.dot_dimension_numbers<[1], [0], [0], [1], [0, 0, 1, 1], [], []>, precision = #tpu.contract_precision<fp32>} : vector<8x8xf32>, vector<8x256xf32>, vector<8x256xf32> -> vector<8x256xf32>
    %77 = arith.addf %73, %76 : vector<8x256xf32>
    %c255_i32 = arith.constant 255 : i32
    %78 = tpu.dynamic_rotate %1 by %c255_i32 dim 1 : vector<8x256xf32>, i32 -> vector<8x256xf32>
    %cst_42 = arith.constant 0.000000e+00 : f32
    %79 = vector.shape_cast %20 : vector<1x256xi1> to vector<1x256xi1>
    %80 = vector.broadcast %79 : vector<1x256xi1> to vector<8x256xi1>
    %81 = vector.broadcast %cst_42 : f32 to vector<8x256xf32>
    %82 = arith.select %80, %78, %81 : vector<8x256xi1>, vector<8x256xf32>
    %c5 = arith.constant 5 : index
    %c0_43 = arith.constant 0 : index
    %c0_44 = arith.constant 0 : index
    %83 = vector.load %arg2[%c5, %c0_43, %c0_44] : memref<9x8x8xf32, #tpu.memory_space<vmem>>, vector<1x8x8xf32>
    %84 = vector.shape_cast %83 : vector<1x8x8xf32> to vector<8x8xf32>
    %cst_45 = arith.constant dense<0.000000e+00> : vector<8x256xf32>
    %85 = tpu.matmul %84, %82, %cst_45 {dimension_numbers = #tpu.dot_dimension_numbers<[1], [0], [0], [1], [0, 0, 1, 1], [], []>, precision = #tpu.contract_precision<fp32>} : vector<8x8xf32>, vector<8x256xf32>, vector<8x256xf32> -> vector<8x256xf32>
    %86 = arith.addf %77, %85 : vector<8x256xf32>
    %c241_i32 = arith.constant 241 : i32
    %87 = tpu.dynamic_rotate %1 by %c241_i32 dim 1 : vector<8x256xf32>, i32 -> vector<8x256xf32>
    %cst_46 = arith.constant 0.000000e+00 : f32
    %88 = vector.shape_cast %25 : vector<1x256xi1> to vector<1x256xi1>
    %89 = vector.broadcast %88 : vector<1x256xi1> to vector<8x256xi1>
    %90 = vector.broadcast %cst_46 : f32 to vector<8x256xf32>
    %91 = arith.select %89, %87, %90 : vector<8x256xi1>, vector<8x256xf32>
    %c6 = arith.constant 6 : index
    %c0_47 = arith.constant 0 : index
    %c0_48 = arith.constant 0 : index
    %92 = vector.load %arg2[%c6, %c0_47, %c0_48] : memref<9x8x8xf32, #tpu.memory_space<vmem>>, vector<1x8x8xf32>
    %93 = vector.shape_cast %92 : vector<1x8x8xf32> to vector<8x8xf32>
    %cst_49 = arith.constant dense<0.000000e+00> : vector<8x256xf32>
    %94 = tpu.matmul %93, %91, %cst_49 {dimension_numbers = #tpu.dot_dimension_numbers<[1], [0], [0], [1], [0, 0, 1, 1], [], []>, precision = #tpu.contract_precision<fp32>} : vector<8x8xf32>, vector<8x256xf32>, vector<8x256xf32> -> vector<8x256xf32>
    %95 = arith.addf %86, %94 : vector<8x256xf32>
    %c240_i32_50 = arith.constant 240 : i32
    %96 = tpu.dynamic_rotate %1 by %c240_i32_50 dim 1 : vector<8x256xf32>, i32 -> vector<8x256xf32>
    %cst_51 = arith.constant 0.000000e+00 : f32
    %97 = vector.shape_cast %27 : vector<1x256xi1> to vector<1x256xi1>
    %98 = vector.broadcast %97 : vector<1x256xi1> to vector<8x256xi1>
    %99 = vector.broadcast %cst_51 : f32 to vector<8x256xf32>
    %100 = arith.select %98, %96, %99 : vector<8x256xi1>, vector<8x256xf32>
    %c7 = arith.constant 7 : index
    %c0_52 = arith.constant 0 : index
    %c0_53 = arith.constant 0 : index
    %101 = vector.load %arg2[%c7, %c0_52, %c0_53] : memref<9x8x8xf32, #tpu.memory_space<vmem>>, vector<1x8x8xf32>
    %102 = vector.shape_cast %101 : vector<1x8x8xf32> to vector<8x8xf32>
    %cst_54 = arith.constant dense<0.000000e+00> : vector<8x256xf32>
    %103 = tpu.matmul %102, %100, %cst_54 {dimension_numbers = #tpu.dot_dimension_numbers<[1], [0], [0], [1], [0, 0, 1, 1], [], []>, precision = #tpu.contract_precision<fp32>} : vector<8x8xf32>, vector<8x256xf32>, vector<8x256xf32> -> vector<8x256xf32>
    %104 = arith.addf %95, %103 : vector<8x256xf32>
    %c239_i32 = arith.constant 239 : i32
    %105 = tpu.dynamic_rotate %1 by %c239_i32 dim 1 : vector<8x256xf32>, i32 -> vector<8x256xf32>
    %cst_55 = arith.constant 0.000000e+00 : f32
    %106 = vector.shape_cast %32 : vector<1x256xi1> to vector<1x256xi1>
    %107 = vector.broadcast %106 : vector<1x256xi1> to vector<8x256xi1>
    %108 = vector.broadcast %cst_55 : f32 to vector<8x256xf32>
    %109 = arith.select %107, %105, %108 : vector<8x256xi1>, vector<8x256xf32>
    %c8 = arith.constant 8 : index
    %c0_56 = arith.constant 0 : index
    %c0_57 = arith.constant 0 : index
    %110 = vector.load %arg2[%c8, %c0_56, %c0_57] : memref<9x8x8xf32, #tpu.memory_space<vmem>>, vector<1x8x8xf32>
    %111 = vector.shape_cast %110 : vector<1x8x8xf32> to vector<8x8xf32>
    %cst_58 = arith.constant dense<0.000000e+00> : vector<8x256xf32>
    %112 = tpu.matmul %111, %109, %cst_58 {dimension_numbers = #tpu.dot_dimension_numbers<[1], [0], [0], [1], [0, 0, 1, 1], [], []>, precision = #tpu.contract_precision<fp32>} : vector<8x8xf32>, vector<8x256xf32>, vector<8x256xf32> -> vector<8x256xf32>
    %113 = arith.addf %104, %112 : vector<8x256xf32>
    %cst_59 = arith.constant dense<0.000000e+00> : vector<8xf32>
    %114 = vector.multi_reduction <add>, %113, %cst_59 [1] : vector<8x256xf32> to vector<8xf32>
    %115 = vector.shape_cast %114 : vector<8xf32> to vector<8x1xf32>
    %cst_60 = arith.constant 3.906250e-03 : f32
    %116 = vector.broadcast %cst_60 : f32 to vector<8x1xf32>
    %117 = arith.mulf %115, %116 : vector<8x1xf32>
    %118 = vector.broadcast %117 : vector<8x1xf32> to vector<8x256xf32>
    %119 = arith.subf %113, %118 : vector<8x256xf32>
    %120 = arith.mulf %119, %119 : vector<8x256xf32>
    %cst_61 = arith.constant dense<0.000000e+00> : vector<8xf32>
    %121 = vector.multi_reduction <add>, %120, %cst_61 [1] : vector<8x256xf32> to vector<8xf32>
    %122 = vector.shape_cast %121 : vector<8xf32> to vector<8x1xf32>
    %cst_62 = arith.constant 3.906250e-03 : f32
    %123 = vector.broadcast %cst_62 : f32 to vector<8x1xf32>
    %124 = arith.mulf %122, %123 : vector<8x1xf32>
    %cst_63 = arith.constant 9.99999974E-6 : f32
    %125 = vector.broadcast %cst_63 : f32 to vector<8x1xf32>
    %126 = arith.addf %124, %125 : vector<8x1xf32>
    %127 = math.rsqrt %126 : vector<8x1xf32>
    %128 = vector.broadcast %127 : vector<8x1xf32> to vector<8x256xf32>
    %129 = arith.mulf %119, %128 : vector<8x256xf32>
    %130 = vector.broadcast %33 : vector<8x1xf32> to vector<8x256xf32>
    %131 = arith.mulf %129, %130 : vector<8x256xf32>
    %132 = vector.broadcast %34 : vector<8x1xf32> to vector<8x256xf32>
    %133 = arith.addf %131, %132 : vector<8x256xf32>
    %cst_64 = arith.constant 0.000000e+00 : f32
    %134 = vector.broadcast %cst_64 : f32 to vector<8x256xf32>
    %135 = arith.maximumf %133, %134 : vector<8x256xf32>
    %cst_65 = arith.constant 0.000000e+00 : f32
    %136 = vector.broadcast %cst_65 : f32 to vector<8x256xf32>
    %c17_i32_66 = arith.constant 17 : i32
    %137 = tpu.dynamic_rotate %135 by %c17_i32_66 dim 1 : vector<8x256xf32>, i32 -> vector<8x256xf32>
    %cst_67 = arith.constant 0.000000e+00 : f32
    %138 = vector.shape_cast %9 : vector<1x256xi1> to vector<1x256xi1>
    %139 = vector.broadcast %138 : vector<1x256xi1> to vector<8x256xi1>
    %140 = vector.broadcast %cst_67 : f32 to vector<8x256xf32>
    %141 = arith.select %139, %137, %140 : vector<8x256xi1>, vector<8x256xf32>
    %c0_68 = arith.constant 0 : index
    %c0_69 = arith.constant 0 : index
    %c0_70 = arith.constant 0 : index
    %142 = vector.load %arg3[%c0_68, %c0_69, %c0_70] : memref<9x8x8xf32, #tpu.memory_space<vmem>>, vector<1x8x8xf32>
    %143 = vector.shape_cast %142 : vector<1x8x8xf32> to vector<8x8xf32>
    %cst_71 = arith.constant dense<0.000000e+00> : vector<8x256xf32>
    %144 = tpu.matmul %143, %141, %cst_71 {dimension_numbers = #tpu.dot_dimension_numbers<[1], [0], [0], [1], [0, 0, 1, 1], [], []>, precision = #tpu.contract_precision<fp32>} : vector<8x8xf32>, vector<8x256xf32>, vector<8x256xf32> -> vector<8x256xf32>
    %145 = arith.addf %136, %144 : vector<8x256xf32>
    %c16_i32_72 = arith.constant 16 : i32
    %146 = tpu.dynamic_rotate %135 by %c16_i32_72 dim 1 : vector<8x256xf32>, i32 -> vector<8x256xf32>
    %cst_73 = arith.constant 0.000000e+00 : f32
    %147 = vector.shape_cast %11 : vector<1x256xi1> to vector<1x256xi1>
    %148 = vector.broadcast %147 : vector<1x256xi1> to vector<8x256xi1>
    %149 = vector.broadcast %cst_73 : f32 to vector<8x256xf32>
    %150 = arith.select %148, %146, %149 : vector<8x256xi1>, vector<8x256xf32>
    %c1_74 = arith.constant 1 : index
    %c0_75 = arith.constant 0 : index
    %c0_76 = arith.constant 0 : index
    %151 = vector.load %arg3[%c1_74, %c0_75, %c0_76] : memref<9x8x8xf32, #tpu.memory_space<vmem>>, vector<1x8x8xf32>
    %152 = vector.shape_cast %151 : vector<1x8x8xf32> to vector<8x8xf32>
    %cst_77 = arith.constant dense<0.000000e+00> : vector<8x256xf32>
    %153 = tpu.matmul %152, %150, %cst_77 {dimension_numbers = #tpu.dot_dimension_numbers<[1], [0], [0], [1], [0, 0, 1, 1], [], []>, precision = #tpu.contract_precision<fp32>} : vector<8x8xf32>, vector<8x256xf32>, vector<8x256xf32> -> vector<8x256xf32>
    %154 = arith.addf %145, %153 : vector<8x256xf32>
    %c15_i32_78 = arith.constant 15 : i32
    %155 = tpu.dynamic_rotate %135 by %c15_i32_78 dim 1 : vector<8x256xf32>, i32 -> vector<8x256xf32>
    %cst_79 = arith.constant 0.000000e+00 : f32
    %156 = vector.shape_cast %16 : vector<1x256xi1> to vector<1x256xi1>
    %157 = vector.broadcast %156 : vector<1x256xi1> to vector<8x256xi1>
    %158 = vector.broadcast %cst_79 : f32 to vector<8x256xf32>
    %159 = arith.select %157, %155, %158 : vector<8x256xi1>, vector<8x256xf32>
    %c2_80 = arith.constant 2 : index
    %c0_81 = arith.constant 0 : index
    %c0_82 = arith.constant 0 : index
    %160 = vector.load %arg3[%c2_80, %c0_81, %c0_82] : memref<9x8x8xf32, #tpu.memory_space<vmem>>, vector<1x8x8xf32>
    %161 = vector.shape_cast %160 : vector<1x8x8xf32> to vector<8x8xf32>
    %cst_83 = arith.constant dense<0.000000e+00> : vector<8x256xf32>
    %162 = tpu.matmul %161, %159, %cst_83 {dimension_numbers = #tpu.dot_dimension_numbers<[1], [0], [0], [1], [0, 0, 1, 1], [], []>, precision = #tpu.contract_precision<fp32>} : vector<8x8xf32>, vector<8x256xf32>, vector<8x256xf32> -> vector<8x256xf32>
    %163 = arith.addf %154, %162 : vector<8x256xf32>
    %c1_i32_84 = arith.constant 1 : i32
    %164 = tpu.dynamic_rotate %135 by %c1_i32_84 dim 1 : vector<8x256xf32>, i32 -> vector<8x256xf32>
    %cst_85 = arith.constant 0.000000e+00 : f32
    %165 = vector.shape_cast %18 : vector<1x256xi1> to vector<1x256xi1>
    %166 = vector.broadcast %165 : vector<1x256xi1> to vector<8x256xi1>
    %167 = vector.broadcast %cst_85 : f32 to vector<8x256xf32>
    %168 = arith.select %166, %164, %167 : vector<8x256xi1>, vector<8x256xf32>
    %c3_86 = arith.constant 3 : index
    %c0_87 = arith.constant 0 : index
    %c0_88 = arith.constant 0 : index
    %169 = vector.load %arg3[%c3_86, %c0_87, %c0_88] : memref<9x8x8xf32, #tpu.memory_space<vmem>>, vector<1x8x8xf32>
    %170 = vector.shape_cast %169 : vector<1x8x8xf32> to vector<8x8xf32>
    %cst_89 = arith.constant dense<0.000000e+00> : vector<8x256xf32>
    %171 = tpu.matmul %170, %168, %cst_89 {dimension_numbers = #tpu.dot_dimension_numbers<[1], [0], [0], [1], [0, 0, 1, 1], [], []>, precision = #tpu.contract_precision<fp32>} : vector<8x8xf32>, vector<8x256xf32>, vector<8x256xf32> -> vector<8x256xf32>
    %172 = arith.addf %163, %171 : vector<8x256xf32>
    %c4_90 = arith.constant 4 : index
    %c0_91 = arith.constant 0 : index
    %c0_92 = arith.constant 0 : index
    %173 = vector.load %arg3[%c4_90, %c0_91, %c0_92] : memref<9x8x8xf32, #tpu.memory_space<vmem>>, vector<1x8x8xf32>
    %174 = vector.shape_cast %173 : vector<1x8x8xf32> to vector<8x8xf32>
    %cst_93 = arith.constant dense<0.000000e+00> : vector<8x256xf32>
    %175 = tpu.matmul %174, %135, %cst_93 {dimension_numbers = #tpu.dot_dimension_numbers<[1], [0], [0], [1], [0, 0, 1, 1], [], []>, precision = #tpu.contract_precision<fp32>} : vector<8x8xf32>, vector<8x256xf32>, vector<8x256xf32> -> vector<8x256xf32>
    %176 = arith.addf %172, %175 : vector<8x256xf32>
    %c255_i32_94 = arith.constant 255 : i32
    %177 = tpu.dynamic_rotate %135 by %c255_i32_94 dim 1 : vector<8x256xf32>, i32 -> vector<8x256xf32>
    %cst_95 = arith.constant 0.000000e+00 : f32
    %178 = vector.shape_cast %20 : vector<1x256xi1> to vector<1x256xi1>
    %179 = vector.broadcast %178 : vector<1x256xi1> to vector<8x256xi1>
    %180 = vector.broadcast %cst_95 : f32 to vector<8x256xf32>
    %181 = arith.select %179, %177, %180 : vector<8x256xi1>, vector<8x256xf32>
    %c5_96 = arith.constant 5 : index
    %c0_97 = arith.constant 0 : index
    %c0_98 = arith.constant 0 : index
    %182 = vector.load %arg3[%c5_96, %c0_97, %c0_98] : memref<9x8x8xf32, #tpu.memory_space<vmem>>, vector<1x8x8xf32>
    %183 = vector.shape_cast %182 : vector<1x8x8xf32> to vector<8x8xf32>
    %cst_99 = arith.constant dense<0.000000e+00> : vector<8x256xf32>
    %184 = tpu.matmul %183, %181, %cst_99 {dimension_numbers = #tpu.dot_dimension_numbers<[1], [0], [0], [1], [0, 0, 1, 1], [], []>, precision = #tpu.contract_precision<fp32>} : vector<8x8xf32>, vector<8x256xf32>, vector<8x256xf32> -> vector<8x256xf32>
    %185 = arith.addf %176, %184 : vector<8x256xf32>
    %c241_i32_100 = arith.constant 241 : i32
    %186 = tpu.dynamic_rotate %135 by %c241_i32_100 dim 1 : vector<8x256xf32>, i32 -> vector<8x256xf32>
    %cst_101 = arith.constant 0.000000e+00 : f32
    %187 = vector.shape_cast %25 : vector<1x256xi1> to vector<1x256xi1>
    %188 = vector.broadcast %187 : vector<1x256xi1> to vector<8x256xi1>
    %189 = vector.broadcast %cst_101 : f32 to vector<8x256xf32>
    %190 = arith.select %188, %186, %189 : vector<8x256xi1>, vector<8x256xf32>
    %c6_102 = arith.constant 6 : index
    %c0_103 = arith.constant 0 : index
    %c0_104 = arith.constant 0 : index
    %191 = vector.load %arg3[%c6_102, %c0_103, %c0_104] : memref<9x8x8xf32, #tpu.memory_space<vmem>>, vector<1x8x8xf32>
    %192 = vector.shape_cast %191 : vector<1x8x8xf32> to vector<8x8xf32>
    %cst_105 = arith.constant dense<0.000000e+00> : vector<8x256xf32>
    %193 = tpu.matmul %192, %190, %cst_105 {dimension_numbers = #tpu.dot_dimension_numbers<[1], [0], [0], [1], [0, 0, 1, 1], [], []>, precision = #tpu.contract_precision<fp32>} : vector<8x8xf32>, vector<8x256xf32>, vector<8x256xf32> -> vector<8x256xf32>
    %194 = arith.addf %185, %193 : vector<8x256xf32>
    %c240_i32_106 = arith.constant 240 : i32
    %195 = tpu.dynamic_rotate %135 by %c240_i32_106 dim 1 : vector<8x256xf32>, i32 -> vector<8x256xf32>
    %cst_107 = arith.constant 0.000000e+00 : f32
    %196 = vector.shape_cast %27 : vector<1x256xi1> to vector<1x256xi1>
    %197 = vector.broadcast %196 : vector<1x256xi1> to vector<8x256xi1>
    %198 = vector.broadcast %cst_107 : f32 to vector<8x256xf32>
    %199 = arith.select %197, %195, %198 : vector<8x256xi1>, vector<8x256xf32>
    %c7_108 = arith.constant 7 : index
    %c0_109 = arith.constant 0 : index
    %c0_110 = arith.constant 0 : index
    %200 = vector.load %arg3[%c7_108, %c0_109, %c0_110] : memref<9x8x8xf32, #tpu.memory_space<vmem>>, vector<1x8x8xf32>
    %201 = vector.shape_cast %200 : vector<1x8x8xf32> to vector<8x8xf32>
    %cst_111 = arith.constant dense<0.000000e+00> : vector<8x256xf32>
    %202 = tpu.matmul %201, %199, %cst_111 {dimension_numbers = #tpu.dot_dimension_numbers<[1], [0], [0], [1], [0, 0, 1, 1], [], []>, precision = #tpu.contract_precision<fp32>} : vector<8x8xf32>, vector<8x256xf32>, vector<8x256xf32> -> vector<8x256xf32>
    %203 = arith.addf %194, %202 : vector<8x256xf32>
    %c239_i32_112 = arith.constant 239 : i32
    %204 = tpu.dynamic_rotate %135 by %c239_i32_112 dim 1 : vector<8x256xf32>, i32 -> vector<8x256xf32>
    %cst_113 = arith.constant 0.000000e+00 : f32
    %205 = vector.shape_cast %32 : vector<1x256xi1> to vector<1x256xi1>
    %206 = vector.broadcast %205 : vector<1x256xi1> to vector<8x256xi1>
    %207 = vector.broadcast %cst_113 : f32 to vector<8x256xf32>
    %208 = arith.select %206, %204, %207 : vector<8x256xi1>, vector<8x256xf32>
    %c8_114 = arith.constant 8 : index
    %c0_115 = arith.constant 0 : index
    %c0_116 = arith.constant 0 : index
    %209 = vector.load %arg3[%c8_114, %c0_115, %c0_116] : memref<9x8x8xf32, #tpu.memory_space<vmem>>, vector<1x8x8xf32>
    %210 = vector.shape_cast %209 : vector<1x8x8xf32> to vector<8x8xf32>
    %cst_117 = arith.constant dense<0.000000e+00> : vector<8x256xf32>
    %211 = tpu.matmul %210, %208, %cst_117 {dimension_numbers = #tpu.dot_dimension_numbers<[1], [0], [0], [1], [0, 0, 1, 1], [], []>, precision = #tpu.contract_precision<fp32>} : vector<8x8xf32>, vector<8x256xf32>, vector<8x256xf32> -> vector<8x256xf32>
    %212 = arith.addf %203, %211 : vector<8x256xf32>
    %cst_118 = arith.constant dense<0.000000e+00> : vector<8xf32>
    %213 = vector.multi_reduction <add>, %212, %cst_118 [1] : vector<8x256xf32> to vector<8xf32>
    %214 = vector.shape_cast %213 : vector<8xf32> to vector<8x1xf32>
    %cst_119 = arith.constant 3.906250e-03 : f32
    %215 = vector.broadcast %cst_119 : f32 to vector<8x1xf32>
    %216 = arith.mulf %214, %215 : vector<8x1xf32>
    %217 = vector.broadcast %216 : vector<8x1xf32> to vector<8x256xf32>
    %218 = arith.subf %212, %217 : vector<8x256xf32>
    %219 = arith.mulf %218, %218 : vector<8x256xf32>
    %cst_120 = arith.constant dense<0.000000e+00> : vector<8xf32>
    %220 = vector.multi_reduction <add>, %219, %cst_120 [1] : vector<8x256xf32> to vector<8xf32>
    %221 = vector.shape_cast %220 : vector<8xf32> to vector<8x1xf32>
    %cst_121 = arith.constant 3.906250e-03 : f32
    %222 = vector.broadcast %cst_121 : f32 to vector<8x1xf32>
    %223 = arith.mulf %221, %222 : vector<8x1xf32>
    %cst_122 = arith.constant 9.99999974E-6 : f32
    %224 = vector.broadcast %cst_122 : f32 to vector<8x1xf32>
    %225 = arith.addf %223, %224 : vector<8x1xf32>
    %226 = math.rsqrt %225 : vector<8x1xf32>
    %227 = vector.broadcast %226 : vector<8x1xf32> to vector<8x256xf32>
    %228 = arith.mulf %218, %227 : vector<8x256xf32>
    %229 = vector.broadcast %35 : vector<8x1xf32> to vector<8x256xf32>
    %230 = arith.mulf %228, %229 : vector<8x256xf32>
    %231 = vector.broadcast %36 : vector<8x1xf32> to vector<8x256xf32>
    %232 = arith.addf %230, %231 : vector<8x256xf32>
    %233 = arith.addf %1, %232 : vector<8x256xf32>
    %c0_123 = arith.constant 0 : index
    %c0_124 = arith.constant 0 : index
    %c0_125 = arith.constant 0 : index
    %234 = vector.load %arg5[%c0_123, %c0_124, %c0_125] : memref<1x8x256xf32, #tpu.memory_space<vmem>>, vector<1x8x256xf32>
    %235 = vector.shape_cast %234 : vector<1x8x256xf32> to vector<8x256xf32>
    %236 = vector.shape_cast %233 : vector<8x256xf32> to vector<1x8x256xf32>
    tpu.vector_store %arg5[%c0_123, %c0_124, %c0_125], %236 {strides = array<i32>} : memref<1x8x256xf32, #tpu.memory_space<vmem>>, vector<1x8x256xf32>,
    return
  }
  func.func @transform_0(%arg0: i32) -> (i32, i32, i32) {
    %c0_i32 = arith.constant 0 : i32
    %c0_i32_0 = arith.constant 0 : i32
    %c0_i32_1 = arith.constant 0 : i32
    return %arg0, %c0_i32, %c0_i32_0 : i32, i32, i32
  }
  func.func @transform_1(%arg0: i32) -> (i32, i32, i32) {
    %c0_i32 = arith.constant 0 : i32
    %c0_i32_0 = arith.constant 0 : i32
    %c0_i32_1 = arith.constant 0 : i32
    %c0_i32_2 = arith.constant 0 : i32
    return %c0_i32, %c0_i32_0, %c0_i32_1 : i32, i32, i32
  }
  func.func @transform_2(%arg0: i32) -> (i32, i32, i32) {
    %c0_i32 = arith.constant 0 : i32
    %c0_i32_0 = arith.constant 0 : i32
    %c0_i32_1 = arith.constant 0 : i32
    %c0_i32_2 = arith.constant 0 : i32
    return %c0_i32, %c0_i32_0, %c0_i32_1 : i32, i32, i32
  }
  func.func @transform_3(%arg0: i32) -> (i32, i32) {
    %c0_i32 = arith.constant 0 : i32
    %c0_i32_0 = arith.constant 0 : i32
    %c0_i32_1 = arith.constant 0 : i32
    return %c0_i32, %c0_i32_0 : i32, i32
  }
  func.func @transform_4(%arg0: i32) -> (i32, i32, i32) {
    %c0_i32 = arith.constant 0 : i32
    %c0_i32_0 = arith.constant 0 : i32
    %c0_i32_1 = arith.constant 0 : i32
    return %arg0, %c0_i32, %c0_i32_0 : i32, i32, i32
  }
}

</mosaic_0001>

<bundles_post_ra>
// kernel: tpu_custom_call.1
= control target key start
LH: loop header
LB: loop body
LE: loop exit
PB: predicated region body
PF: predicated region fallthrough
CT: control target
= control target key end

     0   :  { %9 = vsyncpa [#allocation3], 0  ;;  %s9998_s0 = inlined_call_operand.vmem [shape: f32[2,8,256], index: 0, kind: input, shape index: {}]   ;;  %s9999_s1 = inlined_call_operand.vmem [shape: f32[9,8,8], index: 1, kind: input, shape index: {}]   ;;  %s10000_s2 = inlined_call_operand.vmem [shape: f32[9,8,8], index: 2, kind: input, shape index: {}]   ;;  %s10001_s3 = inlined_call_operand.vmem [shape: f32[8,4], index: 3, kind: input, shape index: {}]   ;;  %s10002_s4 = inlined_call_operand.hbm [shape: f32[2,8,256], index: 4, kind: output, shape index: {}]  }
   0x1   :  { %11 = vsyncpa [#allocation3 + $0x1], 0  ;;  %s9420_s15 = smov 0   ;;  %s9422_s16 = smov 0  }
   0x2   :  { %s9424_s17 = smov 0   ;;  %s9426_s18 = smov 0  }
   0x3 LB: > { %s9441_s19 = sadd.s32 4294967295, %s9379_s18   ;;  %s9012_s20 = sadd.s32 4294967294, %s9379_s18   ;;  %s9379_s18 = sphi %s9426_s18, %s10033_s18   ;;  %s9375_s17 = sphi %s9424_s17, %s10032_s17   ;;  %s9371_s16 = sphi %s9422_s16, %s10031_s16   ;;  %s9367_s15 = sphi %s9420_s15, %s10030_s15  }
   0x4   : > { %s9445_s21 = sadd.s32 1, %s9379_s18   ;;  %s113_s22 = sadd.s32 1, %s9375_s17 }
   0x5   : > { %s110_s23 = ssub.s32 %s9379_s18, %s9445_s21  ;;  %p123_p0 = scmp.ne.s32.totalorder %s9375_s17, %s9371_s16 }
   0x6   : > { %p111_p1 = scmp.eq.s32.totalorder %s110_s23, 0  ;;  %p124_p2 = scmp.eq.s32.totalorder %s9441_s19, 1 }
   0x7   : > { %p129_p3 = scmp.ne.s32.totalorder %s9371_s16, %s9367_s15  ;;  %p130_p4 = scmp.eq.s32.totalorder %s9012_s20, 1 }
   0x8   : > { %s9456_s24 = scalar_select %p111_p1, %s9375_s17, %s113_s22  }
   0x9   : > { %p9458_p5 = por %p124_p2, %p123_p0  ;;  %p9462_p6 = por %p130_p4, %p129_p3 }
   0xa   : > { %p9015_p7 = scmp.ge.s32.totalorder %s9379_s18, 1  ;;  %p165_p8 = scmp.lt.s32.totalorder %s9379_s18, 3 }
   0xc   : > { %p166_p9 = pnand %p9015_p7, %p165_p8 }
   0xd   : > { %p191_p10 = scmp.lt.s32.totalorder (!%p166_p9), %s9441_s19, 1  ;;  %v9381_v0 = vmov (!%p166_p9), 0.0   ;;  %s9382_s6 = smov (!%p166_p9), 16   ;;  %v9019_v3 = vld [vmem:[%s9999_s1 + $0x8] sm:$0xff] (!%p166_p9)  ;;  %vm249_vm0 = vcmask (!%p166_p9), 64512   ;;  %v198_v6 = vlaneseq (!%p166_p9)  ;;  %v233_v37 = vld [vmem:[%s9999_s1] sm:$0xff] (!%p166_p9) }
   0xe   : > { %169 = sbr.rel (%p166_p9) target bundleno = 2196 (0x894), region = 36  ;;  %319 = vmatprep.mubr.f32.mxu0 (!%p166_p9), %v9381_v0  ;;  %4687 = vmatprep.mubr.f32.mxu1 (!%p166_p9), %v9381_v0  ;;  %s9383_s7 = smov (!%p166_p9), 17   ;;  %v251_v4 = vsel (!%p166_p9), %vm249_vm0, %v9019_v3, 0  ;;  %v719_v40 = vsel (!%p166_p9), %vm249_vm0, %v233_v37, 0  ;;  %v9020_v63 = vld [vmem:[%s9999_s1 + $0x10] sm:$0xff] (!%p166_p9) }
   0xf   : > { %s9384_s8 = smov (!%p166_p9), 15   ;;  %s9385_s9 = smov (!%p166_p9), 1   ;;  %v9507_v5 = vand.u32 (!%p166_p9), 4294901760, %v251_v4  ;;  %v9510_v8 = vand.u32 (!%p166_p9), 127, %v198_v6  ;;  %v9563_v43 = vand.u32 (!%p166_p9), 4294901760, %v719_v40 }
  0x10   : > { %s9386_s12 = smov (!%p166_p9), 127   ;;  %s9387_s20 = smov (!%p166_p9), 113  }
  0x11   : > { %v321_v7 = vsub.f32 (!%p166_p9), %v251_v4, %v9507_v5  ;;  %vm238_vm1 = vcmp.lt.s32.totalorder (!%p166_p9), %v9510_v8, 16  ;;  %vm203_vm2 = vcmp.ge.s32.totalorder (!%p166_p9), %v9510_v8, 16  ;;  %v9523_v28 = vadd.s32 (!%p166_p9), 128, %v9510_v8  ;;  %s9389_s30 = smov (!%p166_p9), 111  }
  0x12   : > { %vm224_vm3 = vcmp.lt.s32.totalorder (!%p166_p9), %v9510_v8, 17  ;;  %v201_v33 = vand.u32 (!%p166_p9), 15, %v9510_v8  ;;  %v789_v46 = vsub.f32 (!%p166_p9), %v719_v40, %v9563_v43  ;;  %vm1190_vm7 = vcmp.lt.s32.totalorder (!%p166_p9), %v9510_v8, 15 }
  0x13   : > { %v322_v9 = vand.u32 (!%p166_p9), 4294901760, %v321_v7  ;;  %v202_v29 = vand.u32 (!%p166_p9), 15, %v9523_v28  ;;  %vm1675_vm11 = vcmp.lt.s32.totalorder (!%p166_p9), %v9510_v8, 1  ;;  %vm10005_vm12 = vcmp.lt.s32.totalorder (!%p166_p9), %v9510_v8, 127 }
  0x14   : > { %vm9538_vm5 = vcmp.ge.s32.totalorder (!%p166_p9), %v201_v33, 1  ;;  %v790_v49 = vand.u32 (!%p166_p9), 4294901760, %v789_v46  ;;  %vm9583_vm9 = vcmp.lt.s32.totalorder (!%p166_p9), %v201_v33, 15  ;;  %vm214_vm13 = vcmp.lt.s32.totalorder (!%p166_p9), %v9523_v28, 240 }
  0x15   : > { %s192_s27 = scalar_select %p191_p10, %s9441_s19, 1  ;;  %v323_v11 = vsub.f32 %v321_v7, %v322_v9  ;;  %vm9528_vm4 = vcmp.ge.s32.totalorder %v202_v29, 1  ;;  %vm9550_vm6 = vmand %vm203_vm2, %vm9538_vm5  ;;  %vm9574_vm8 = vcmp.lt.s32.totalorder %v202_v29, 15  ;;  %vm10003_vm14 = vcmp.lt.s32.totalorder %v9510_v8, 113 }
  0x16   : > { %v791_v52 = vsub.f32 %v789_v46, %v790_v49  ;;  %vm9594_vm10 = vmand %vm203_vm2, %vm9583_vm9 }
  0x17   : > { %s9040_s28 = sshll.u32 %s192_s27, 4  ;;  %v324_v17 = vand.u32 4294901760, %v323_v11  ;;  %s9388_s27 = smov 112   ;;  %vm9682_vm15 = vmand %vm214_vm13, %vm9528_vm4 }
  0x18   : > { %s9475_s5 = scalar_lea.vmem %s9998_s0, %s9040_s28  ;;  %v792_v54 = vand.u32 4294901760, %v791_v52 }
  0x19   : > { %v9478_v1 = vld [vmem:[%s9475_s5] sm:$0xff]  ;;  %v9485_v2 = vld [vmem:[%s9475_s5 + $0x8] sm:$0xff] }
  0x1a   : > { %234 = vrot.lane.b32.xlu0 %v9478_v1, %s9382_s6  ;;  %220 = vrot.lane.b32.xlu1 %v9478_v1, %s9383_s7 }
  0x1e   : > { %236 = vrot.lane.b32.xlu0 %v9485_v2, %s9382_s6  ;;  %222 = vrot.lane.b32.xlu1 %v9485_v2, %s9383_s7 }
  0x22   : > { %1188 = vrot.lane.b32.xlu1 %v9485_v2, %s9384_s8  ;;  %1186 = vrot.lane.b32.xlu0 %v9478_v1, %s9384_s8 }
  0x26   : > { %1673 = vrot.lane.b32.xlu1 %v9485_v2, %s9385_s9  ;;  %1671 = vrot.lane.b32.xlu0 %v9478_v1, %s9385_s9 }
  0x2a   : > { %2630 = vrot.lane.b32.xlu1 %v9485_v2, %s9386_s12  ;;  %2628 = vrot.lane.b32.xlu0 %v9478_v1, %s9386_s12 }
  0x2e   : > { %3115 = vrot.lane.b32.xlu1 %v9485_v2, %s9387_s20  ;;  %3113 = vrot.lane.b32.xlu0 %v9478_v1, %s9387_s20 }
  0x32   : > { %3600 = vrot.lane.b32.xlu1 %v9485_v2, %s9388_s27  ;;  %3598 = vrot.lane.b32.xlu0 %v9478_v1, %s9388_s27 }
  0x36   : > { %4085 = vrot.lane.b32.xlu1 %v9485_v2, %s9389_s30  ;;  %4083 = vrot.lane.b32.xlu0 %v9478_v1, %s9389_s30 }
  0x8c   : > { %v235_v10 = vpop.permute.xlu0 %234  ;;  %v221_v27 = vpop.permute.xlu1 %220 }
  0x90   : > { %v237_v12 = vpop.permute.xlu0 %236  ;;  %v223_v30 = vpop.permute.xlu1 %222 }
  0x91   : > { %v239_v13 = vsel %vm238_vm1, %v235_v10, %v237_v12  ;;  %v240_v14 = vsel %vm238_vm1, %v237_v12, %v235_v10  ;;  %v225_v32 = vsel %vm224_vm3, %v221_v27, %v223_v30  ;;  %v226_v39 = vsel %vm224_vm3, %v223_v30, %v221_v27  ;;  %v9021_v27 = vld [vmem:[%s9999_s1 + $0x18] sm:$0xff] }
  0x92   : > { %v245_v15 = vsel %vm203_vm2, %v240_v14, 0.0  ;;  %v253_v16 = vand.u32 4294901760, %v239_v13  ;;  %v232_v34 = vsel %vm9528_vm4, %v225_v32, 0.0  ;;  %v231_v42 = vsel %vm9550_vm6, %v226_v39, 0.0 }
  0x93   : > { %v255_v18 = vand.u32 4294901760, %v245_v15  ;;  %v721_v36 = vand.u32 4294901760, %v232_v34  ;;  %v723_v45 = vand.u32 4294901760, %v231_v42  ;;  %v1687_v30 = vsel %vm249_vm0, %v9021_v27, 0 }
  0x94   : > { %v332_v19 = vsub.f32 %v239_v13, %v253_v16  ;;  %254 = vmatprep.subr.mxu0 %v253_v16  ;;  %v1189_v56 = vpop.permute.xlu1 %1188  ;;  %v1187_v57 = vpop.permute.xlu0 %1186 }
  0x95   : > { %v338_v20 = vsub.f32 %v245_v15, %v255_v18  ;;  %256 = vmatpush1.msra.mxu0 %v255_v18  ;;  %v800_v41 = vsub.f32 %v232_v34, %v721_v36  ;;  %v806_v48 = vsub.f32 %v231_v42, %v723_v45  ;;  %v1191_v59 = vsel %vm1190_vm7, %v1187_v57, %v1189_v56 }
  0x96   : > { %325 = vmatmul.mubr.f32.vlgmr.msra.gmra.mrb[0].mxu0 %v324_v17  ;;  %v333_v21 = vand.u32 4294901760, %v332_v19  ;;  %v1198_v60 = vsel %vm9574_vm8, %v1191_v59, 0.0  ;;  %v1192_v4 = vsel %vm1190_vm7, %v1189_v56, %v1187_v57  ;;  %v1756_v34 = vand.u32 4294901760, %v1687_v30 }
  0x97   : > { %v339_v22 = vand.u32 4294901760, %v338_v20  ;;  %405 = vmatprep.mubr.f32.mxu0 %v9381_v0  ;;  %v801_v44 = vand.u32 4294901760, %v800_v41  ;;  %v807_v51 = vand.u32 4294901760, %v806_v48  ;;  %v1204_v62 = vand.u32 4294901760, %v1198_v60 }
  0x98   : > { %v334_v23 = vsub.f32 %v332_v19, %v333_v21  ;;  %v1197_v6 = vsel %vm9594_vm10, %v1192_v4, 0.0  ;;  %v1757_v39 = vsub.f32 %v1687_v30, %v1756_v34 }
  0x99   : > { %v340_v24 = vsub.f32 %v338_v20, %v339_v22  ;;  %v802_v47 = vsub.f32 %v800_v41, %v801_v44  ;;  %v808_v53 = vsub.f32 %v806_v48, %v807_v51  ;;  %v1206_v10 = vand.u32 4294901760, %v1197_v6 }
  0x9a   : > { %v335_v25 = vand.u32 4294901760, %v334_v23  ;;  %v1672_v23 = vpop.permute.xlu0 %1671  ;;  %v1758_v42 = vand.u32 4294901760, %v1757_v39 }
  0x9b   : > { %v341_v26 = vand.u32 4294901760, %v340_v24  ;;  %v803_v50 = vand.u32 4294901760, %v802_v47  ;;  %v809_v55 = vand.u32 4294901760, %v808_v53  ;;  %v1289_v13 = vsub.f32 %v1197_v6, %v1206_v10 }
  0x9c   : > { %336 = vmatprep.subr.mxu0 %v335_v25 }
  0x9d   : > { %342 = vmatpush1.msra.mxu0 %v341_v26 }
  0x9e   : > { %407 = vmatmul.mubr.f32.vlgmr.msra.gmra.mrb[0].mxu0 %v9507_v5  ;;  %415 = vmatprep.subr.mxu0 %v332_v19 }
  0x9f   : > { %418 = vmatpush1.msra.mxu0 %v338_v20  ;;  %481 = vmatprep.mubr.f32.mxu0 %v9381_v0 }
  0xa0   : > { %491 = vmatprep.subr.mxu0 %v253_v16 }
  0xa6   : > { %484 = vmatmul.mubr.f32.vlgmr.msra.gmra.mrb[0].mxu0 %v321_v7  ;;  %v1283_v7 = vsub.f32 %v1198_v60, %v1204_v62 }
  0xa7   : > { %493 = vmatpush1.msra.mxu0 %v255_v18  ;;  %556 = vmatprep.mubr.f32.mxu0 %v9381_v0 }
  0xa8   : > { %569 = vmatprep.subr.mxu0 %v333_v21  ;;  %v1284_v11 = vand.u32 4294901760, %v1283_v7 }
  0xaa   : > { %v1285_v14 = vsub.f32 %v1283_v7, %v1284_v11 }
  0xac   : > { %v1286_v17 = vand.u32 4294901760, %v1285_v14 }
  0xae   : > { %560 = vmatmul.mubr.f32.vlgmr.msra.gmra.mrb[0].mxu0 %v322_v9 }
  0xaf   : > { %573 = vmatpush1.msra.mxu0 %v339_v22  ;;  %636 = vmatprep.mubr.f32.mxu0 %v9381_v0  ;;  %v1674_v22 = vpop.permute.xlu1 %1673 }
  0xb0   : > { %645 = vmatprep.subr.mxu0 %v253_v16  ;;  %v1290_v16 = vand.u32 4294901760, %v1289_v13  ;;  %v1676_v24 = vsel %vm1675_vm11, %v1672_v23, %v1674_v22  ;;  %v1677_v29 = vsel %vm1675_vm11, %v1674_v22, %v1672_v23 }
  0xb1   : > { %v1683_v25 = vsel %vm9528_vm4, %v1676_v24, 0.0  ;;  %v1682_v32 = vsel %vm9538_vm5, %v1677_v29, 0.0 }
  0xb2   : > { %v1291_v19 = vsub.f32 %v1289_v13, %v1290_v16  ;;  %v1689_v26 = vand.u32 4294901760, %v1683_v25 }
  0xb4   : > { %v1292_v21 = vand.u32 4294901760, %v1291_v19  ;;  %v1768_v33 = vsub.f32 %v1683_v25, %v1689_v26 }
  0xb6   : > { %638 = vmatmul.mubr.f32.vlgmr.msra.gmra.mrb[0].mxu0 %v9507_v5  ;;  %v1769_v37 = vand.u32 4294901760, %v1768_v33 }
  0xb7   : > { %647 = vmatpush1.msra.mxu0 %v255_v18  ;;  %710 = vmatprep.mubr.f32.mxu0 %v9381_v0 }
  0xb8   : > { %722 = vmatprep.subr.mxu0 %v721_v36 }
  0xbe   : > { %712 = vmatmul.mubr.f32.vlgmr.msra.gmra.mrb[0].mxu0 %v9507_v5  ;;  %v1202_v5 = vsel %vm249_vm0, %v9020_v63, 0 }
  0xbf   : > { %724 = vmatpush1.msra.mxu0 %v723_v45  ;;  %787 = vmatprep.mubr.f32.mxu0 %v9381_v0  ;;  %v9608_v9 = vand.u32 4294901760, %v1202_v5 }
  0xc0   : > { %804 = vmatprep.subr.mxu0 %v803_v50  ;;  %v9022_v50 = vld [vmem:[%s9999_s1 + $0x20] sm:$0xff] }
  0xc1   : > { %v1272_v12 = vsub.f32 %v1202_v5, %v9608_v9 }
  0xc3   : > { %v1273_v15 = vand.u32 4294901760, %v1272_v12 }
  0xc5   : > { %v1274_v18 = vsub.f32 %v1272_v12, %v1273_v15 }
  0xc6   : > { %793 = vmatmul.mubr.f32.vlgmr.msra.gmra.mrb[0].mxu0 %v792_v54  ;;  %v2163_v54 = vand.u32 4294901760, %v9478_v1 }
  0xc7   : > { %810 = vmatpush1.msra.mxu0 %v809_v55  ;;  %873 = vmatprep.mubr.f32.mxu0 %v9381_v0  ;;  %v1275_v20 = vand.u32 4294901760, %v1274_v18 }
  0xc8   : > { %883 = vmatprep.subr.mxu0 %v800_v41  ;;  %v1770_v41 = vsub.f32 %v1768_v33, %v1769_v37  ;;  %v2246_v57 = vsub.f32 %v9478_v1, %v2163_v54  ;;  %v2631_v1 = vpop.permute.xlu1 %2630 }
  0xce   : > { %875 = vmatmul.mubr.f32.vlgmr.msra.gmra.mrb[0].mxu0 %v9563_v43 }
  0xcf   : > { %886 = vmatpush1.msra.mxu0 %v806_v48  ;;  %949 = vmatprep.mubr.f32.mxu0 %v9381_v0 }
  0xd0   : > { %959 = vmatprep.subr.mxu0 %v721_v36 }
  0xd6   : > { %952 = vmatmul.mubr.f32.vlgmr.msra.gmra.mrb[0].mxu0 %v789_v46 }
  0xd7   : > { %961 = vmatpush1.msra.mxu0 %v723_v45  ;;  %1024 = vmatprep.mubr.f32.mxu0 %v9381_v0 }
  0xd8   : > { %1037 = vmatprep.subr.mxu0 %v801_v44  ;;  %v1771_v44 = vand.u32 4294901760, %v1770_v41 }
  0xde   : > { %1028 = vmatmul.mubr.f32.vlgmr.msra.gmra.mrb[0].mxu0 %v790_v49  ;;  %v2161_v49 = vand.u32 4294901760, %v9485_v2 }
  0xdf   : > { %1041 = vmatpush1.msra.mxu0 %v807_v51  ;;  %1104 = vmatprep.mubr.f32.mxu0 %v9381_v0  ;;  %v2159_v51 = vsel %vm249_vm0, %v9022_v50, 0 }
  0xe0   : > { %1113 = vmatprep.subr.mxu0 %v721_v36  ;;  %v1691_v36 = vand.u32 4294901760, %v1682_v32  ;;  %v2240_v52 = vsub.f32 %v9485_v2, %v2161_v49  ;;  %v2228_v53 = vand.u32 4294901760, %v2159_v51 }
  0xe2   : > { %v1774_v40 = vsub.f32 %v1682_v32, %v1691_v36  ;;  %v2241_v55 = vand.u32 4294901760, %v2240_v52  ;;  %v2229_v56 = vsub.f32 %v2159_v51, %v2228_v53  ;;  %v3116_v32 = vpop.permute.xlu1 %3115 }
  0xe4   : > { %v2242_v59 = vsub.f32 %v2240_v52, %v2241_v55  ;;  %v2230_v60 = vand.u32 4294901760, %v2229_v56 }
  0xe6   : > { %1106 = vmatmul.mubr.f32.vlgmr.msra.gmra.mrb[0].mxu0 %v9563_v43  ;;  %v2243_v63 = vand.u32 4294901760, %v2242_v59  ;;  %v2231_v4 = vsub.f32 %v2229_v56, %v2230_v60  ;;  %v3601_v59 = vpop.permute.xlu1 %3600 }
  0xe7   : > { %1115 = vmatpush1.msra.mxu0 %v723_v45  ;;  %1178 = vmatprep.mubr.f32.mxu0 %v9381_v0  ;;  %v1759_v45 = vsub.f32 %v1757_v39, %v1758_v42 }
  0xe8   : > { %1205 = vmatprep.subr.mxu0 %v1204_v62  ;;  %v2232_v5 = vand.u32 4294901760, %v2231_v4 }
  0xe9   : > { %v1760_v47 = vand.u32 4294901760, %v1759_v45 }
  0xee   : > { %1180 = vmatmul.mubr.f32.vlgmr.msra.gmra.mrb[0].mxu0 %v9563_v43  ;;  %v1775_v43 = vand.u32 4294901760, %v1774_v40 }
  0xef   : > { %1207 = vmatpush1.msra.mxu0 %v1206_v10  ;;  %1270 = vmatprep.mubr.f32.mxu0 %v9381_v0 }
  0xf0   : > { %1287 = vmatprep.subr.mxu0 %v1286_v17  ;;  %v1776_v46 = vsub.f32 %v1774_v40, %v1775_v43 }
  0xf2   : > { %v1777_v48 = vand.u32 4294901760, %v1776_v46 }
  0xf6   : > { %1276 = vmatmul.mubr.f32.vlgmr.msra.gmra.mrb[0].mxu0 %v1275_v20 }
  0xf7   : > { %1293 = vmatpush1.msra.mxu0 %v1292_v21  ;;  %1356 = vmatprep.mubr.f32.mxu0 %v9381_v0 }
  0xf8   : > { %1366 = vmatprep.subr.mxu0 %v1283_v7  ;;  %v2629_v7 = vpop.permute.xlu0 %2628 }
  0xfe   : > { %1358 = vmatmul.mubr.f32.vlgmr.msra.gmra.mrb[0].mxu0 %v9608_v9 }
  0xff   : > { %1369 = vmatpush1.msra.mxu0 %v1289_v13  ;;  %1432 = vmatprep.mubr.f32.mxu0 %v9381_v0  ;;  %v2633_v13 = vsel %vm10005_vm12, %v2629_v7, %v2631_v1 }
 0x100   : > { %1442 = vmatprep.subr.mxu0 %v1204_v62 }
 0x106   : > { %1435 = vmatmul.mubr.f32.vlgmr.msra.gmra.mrb[0].mxu0 %v1272_v12  ;;  %v9023_v12 = vld [vmem:[%s9999_s1 + $0x28] sm:$0xff] }
 0x107   : > { %1444 = vmatpush1.msra.mxu0 %v1206_v10  ;;  %1507 = vmatprep.mubr.f32.mxu0 %v9381_v0  ;;  %v2644_v14 = vsel %vm249_vm0, %v9023_v12, 0 }
 0x108   : > { %1520 = vmatprep.subr.mxu0 %v1284_v11  ;;  %v2713_v17 = vand.u32 4294901760, %v2644_v14 }
 0x10a   : > { %v2714_v20 = vsub.f32 %v2644_v14, %v2713_v17 }
 0x10c   : > { %v2715_v23 = vand.u32 4294901760, %v2714_v20 }
 0x10e   : > { %1511 = vmatmul.mubr.f32.vlgmr.msra.gmra.mrb[0].mxu0 %v1273_v15  ;;  %v2639_v15 = vsel %vm9583_vm9, %v2633_v13, 0.0 }
 0x10f   : > { %1524 = vmatpush1.msra.mxu0 %v1290_v16  ;;  %1587 = vmatprep.mubr.f32.mxu0 %v9381_v0  ;;  %v2648_v18 = vand.u32 4294901760, %v2639_v15 }
 0x110   : > { %1596 = vmatprep.subr.mxu0 %v1204_v62  ;;  %v2247_v62 = vand.u32 4294901760, %v2246_v57 }
 0x111   : > { %v2731_v21 = vsub.f32 %v2639_v15, %v2648_v18 }
 0x112   : > { %v2248_v2 = vsub.f32 %v2246_v57, %v2247_v62 }
 0x113   : > { %v2732_v24 = vand.u32 4294901760, %v2731_v21 }
 0x114   : > { %v2249_v6 = vand.u32 4294901760, %v2248_v2  ;;  %v9025_v2 = vld [vmem:[%s9999_s1 + $0x38] sm:$0xff] }
 0x115   : > { %v2733_v27 = vsub.f32 %v2731_v21, %v2732_v24 }
 0x116   : > { %1589 = vmatmul.mubr.f32.vlgmr.msra.gmra.mrb[0].mxu0 %v9608_v9 }
 0x117   : > { %1598 = vmatpush1.msra.mxu0 %v1206_v10  ;;  %1661 = vmatprep.mubr.f32.mxu0 %v9381_v0  ;;  %v2734_v30 = vand.u32 4294901760, %v2733_v27  ;;  %v9026_v27 = vld [vmem:[%s9999_s1 + $0x40] sm:$0xff] }
 0x118   : > { %1690 = vmatprep.subr.mxu0 %v1689_v26 }
 0x11e   : > { %1663 = vmatmul.mubr.f32.vlgmr.msra.gmra.mrb[0].mxu0 %v9608_v9  ;;  %v2634_v9 = vsel %vm10005_vm12, %v2631_v1, %v2629_v7  ;;  %vm9726_vm12 = vmand %vm214_vm13, %vm9574_vm8 }
 0x11f   : > { %1692 = vmatpush1.msra.mxu0 %v1691_v36  ;;  %1755 = vmatprep.mubr.f32.mxu0 %v9381_v0  ;;  %v2640_v10 = vsel %vm9574_vm8, %v2634_v9, 0.0 }
 0x120   : > { %1772 = vmatprep.subr.mxu0 %v1771_v44  ;;  %v2646_v11 = vand.u32 4294901760, %v2640_v10 }
 0x122   : > { %v2725_v16 = vsub.f32 %v2640_v10, %v2646_v11 }
 0x124   : > { %v2726_v19 = vand.u32 4294901760, %v2725_v16 }
 0x126   : > { %1761 = vmatmul.mubr.f32.vlgmr.msra.gmra.mrb[0].mxu0 %v1760_v47  ;;  %v2727_v22 = vsub.f32 %v2725_v16, %v2726_v19 }
 0x127   : > { %1778 = vmatpush1.msra.mxu0 %v1777_v48  ;;  %1841 = vmatprep.mubr.f32.mxu0 %v9381_v0 }
 0x128   : > { %1851 = vmatprep.subr.mxu0 %v1768_v33  ;;  %v2728_v25 = vand.u32 4294901760, %v2727_v22  ;;  %v3114_v33 = vpop.permute.xlu0 %3113 }
 0x129   : > { %v3118_v41 = vsel %vm10003_vm14, %v3114_v33, %v3116_v32 }
 0x12e   : > { %1843 = vmatmul.mubr.f32.vlgmr.msra.gmra.mrb[0].mxu0 %v1756_v34 }
 0x12f   : > { %1854 = vmatpush1.msra.mxu0 %v1774_v40  ;;  %1917 = vmatprep.mubr.f32.mxu0 %v9381_v0  ;;  %v9024_v40 = vld [vmem:[%s9999_s1 + $0x30] sm:$0xff] }
 0x130   : > { %1927 = vmatprep.subr.mxu0 %v1689_v26 }
 0x136   : > { %1920 = vmatmul.mubr.f32.vlgmr.msra.gmra.mrb[0].mxu0 %v1757_v39 }
 0x137   : > { %1929 = vmatpush1.msra.mxu0 %v1691_v36  ;;  %1992 = vmatprep.mubr.f32.mxu0 %v9381_v0 }
 0x138   : > { %2005 = vmatprep.subr.mxu0 %v1769_v37 }
 0x13e   : > { %1996 = vmatmul.mubr.f32.vlgmr.msra.gmra.mrb[0].mxu0 %v1758_v42  ;;  %v3129_v42 = vsel %vm249_vm0, %v9024_v40, 0 }
 0x13f   : > { %2009 = vmatpush1.msra.mxu0 %v1775_v43  ;;  %2072 = vmatprep.mubr.f32.mxu0 %v9381_v0  ;;  %v3124_v43 = vsel %vm9538_vm5, %v3118_v41, 0.0  ;;  %v3198_v45 = vand.u32 4294901760, %v3129_v42 }
 0x140   : > { %2081 = vmatprep.subr.mxu0 %v1689_v26  ;;  %v2716_v26 = vsub.f32 %v2714_v20, %v2715_v23  ;;  %v3133_v46 = vand.u32 4294901760, %v3124_v43 }
 0x141   : > { %v3199_v48 = vsub.f32 %v3129_v42, %v3198_v45 }
 0x142   : > { %v2717_v29 = vand.u32 4294901760, %v2716_v26 }
 0x143   : > { %v3200_v51 = vand.u32 4294901760, %v3199_v48 }
 0x146   : > { %2074 = vmatmul.mubr.f32.vlgmr.msra.gmra.mrb[0].mxu0 %v1756_v34 }
 0x147   : > { %2083 = vmatpush1.msra.mxu0 %v1691_v36  ;;  %2146 = vmatprep.mubr.f32.mxu0 %v9381_v0  ;;  %v3119_v36 = vsel %vm10003_vm14, %v3116_v32, %v3114_v33  ;;  %vm10004_vm14 = vcmp.lt.s32.totalorder %v9510_v8, 112 }
 0x148   : > { %2162 = vmatprep.subr.mxu0 %v2161_v49  ;;  %v3125_v37 = vsel %vm9682_vm15, %v3119_v36, 0.0 }
 0x149   : > { %v3131_v39 = vand.u32 4294901760, %v3125_v37 }
 0x14b   : > { %v3210_v44 = vsub.f32 %v3125_v37, %v3131_v39 }
 0x14d   : > { %v3211_v47 = vand.u32 4294901760, %v3210_v44 }
 0x14e   : > { %2148 = vmatmul.mubr.f32.vlgmr.msra.gmra.mrb[0].mxu0 %v1756_v34 }
 0x14f   : > { %2164 = vmatpush1.msra.mxu0 %v2163_v54  ;;  %2227 = vmatprep.mubr.f32.mxu0 %v9381_v0  ;;  %v3212_v50 = vsub.f32 %v3210_v44, %v3211_v47 }
 0x150   : > { %2244 = vmatprep.subr.mxu0 %v2243_v63 }
 0x156   : > { %2233 = vmatmul.mubr.f32.vlgmr.msra.gmra.mrb[0].mxu0 %v2232_v5  ;;  %v3614_v5 = vsel %vm249_vm0, %v9025_v2, 0 }
 0x157   : > { %2250 = vmatpush1.msra.mxu0 %v2249_v6  ;;  %2313 = vmatprep.mubr.f32.mxu0 %v9381_v0  ;;  %v3683_v7 = vand.u32 4294901760, %v3614_v5 }
 0x158   : > { %2323 = vmatprep.subr.mxu0 %v2240_v52 }
 0x15e   : > { %2315 = vmatmul.mubr.f32.vlgmr.msra.gmra.mrb[0].mxu0 %v2228_v53 }
 0x15f   : > { %2326 = vmatpush1.msra.mxu0 %v2246_v57  ;;  %2389 = vmatprep.mubr.f32.mxu0 %v9381_v0 }
 0x160   : > { %2399 = vmatprep.subr.mxu0 %v2161_v49 }
 0x166   : > { %2392 = vmatmul.mubr.f32.vlgmr.msra.gmra.mrb[0].mxu0 %v2229_v56 }
 0x167   : > { %2401 = vmatpush1.msra.mxu0 %v2163_v54  ;;  %2464 = vmatprep.mubr.f32.mxu0 %v9381_v0 }
 0x168   : > { %2477 = vmatprep.subr.mxu0 %v2241_v55 }
 0x16e   : > { %2468 = vmatmul.mubr.f32.vlgmr.msra.gmra.mrb[0].mxu0 %v2230_v60  ;;  %v3599_v60 = vpop.permute.xlu0 %3598 }
 0x16f   : > { %2481 = vmatpush1.msra.mxu0 %v2247_v62  ;;  %2544 = vmatprep.mubr.f32.mxu0 %v9381_v0  ;;  %v3604_v62 = vsel %vm10004_vm14, %v3601_v59, %v3599_v60  ;;  %v3603_v6 = vsel %vm10004_vm14, %v3599_v60, %v3601_v59  ;;  %vm4087_vm14 = vcmp.lt.s32.totalorder %v9510_v8, 111 }
 0x170   : > { %2553 = vmatprep.subr.mxu0 %v2161_v49  ;;  %v3216_v49 = vsub.f32 %v3124_v43, %v3133_v46  ;;  %v3610_v63 = vsel %vm214_vm13, %v3604_v62, 0.0  ;;  %v3618_v9 = vand.u32 4294901760, %v3603_v6 }
 0x171   : > { %v3616_v4 = vand.u32 4294901760, %v3610_v63 }
 0x172   : > { %v3217_v52 = vand.u32 4294901760, %v3216_v49  ;;  %v3701_v12 = vsub.f32 %v3603_v6, %v3618_v9  ;;  %v4084_v22 = vpop.permute.xlu0 %4083 }
 0x173   : > { %v3695_v1 = vsub.f32 %v3610_v63, %v3616_v4 }
 0x174   : > { %v3218_v55 = vsub.f32 %v3216_v49, %v3217_v52  ;;  %v3702_v15 = vand.u32 4294901760, %v3701_v12 }
 0x175   : > { %v3696_v10 = vand.u32 4294901760, %v3695_v1 }
 0x176   : > { %2546 = vmatmul.mubr.f32.vlgmr.msra.gmra.mrb[0].mxu0 %v2228_v53  ;;  %v3219_v57 = vand.u32 4294901760, %v3218_v55  ;;  %v9391_v55 = vmov 1  }
 0x177   : > { %2555 = vmatpush1.msra.mxu0 %v2163_v54  ;;  %2618 = vmatprep.mubr.f32.mxu0 %v9381_v0  ;;  %v3201_v54 = vsub.f32 %v3199_v48, %v3200_v51  ;;  %v3697_v13 = vsub.f32 %v3695_v1, %v3696_v10 }
 0x178   : > { %2647 = vmatprep.subr.mxu0 %v2646_v11  ;;  %9307 = vset.pattern.permute.xlu1 %v9391_v55 }
 0x179   : > { %v3202_v56 = vand.u32 4294901760, %v3201_v54  ;;  %v9390_v54 = vmov 0  }
 0x17a   : > { %9306 = vset.pattern.permute.xlu0 %v9390_v54 }
 0x17e   : > { %2620 = vmatmul.mubr.f32.vlgmr.msra.gmra.mrb[0].mxu0 %v2228_v53  ;;  %v3213_v53 = vand.u32 4294901760, %v3212_v50 }
 0x17f   : > { %2649 = vmatpush1.msra.mxu0 %v2648_v18  ;;  %2712 = vmatprep.mubr.f32.mxu0 %v9381_v0 }
 0x180   : > { %2729 = vmatprep.subr.mxu0 %v2728_v25 }
 0x186   : > { %2718 = vmatmul.mubr.f32.vlgmr.msra.gmra.mrb[0].mxu0 %v2717_v29 }
 0x187   : > { %2735 = vmatpush1.msra.mxu0 %v2734_v30  ;;  %2798 = vmatprep.mubr.f32.mxu0 %v9381_v0  ;;  %v4099_v30 = vsel %vm249_vm0, %v9026_v27, 0 }
 0x188   : > { %2808 = vmatprep.subr.mxu0 %v2725_v16  ;;  %v3698_v16 = vand.u32 4294901760, %v3697_v13  ;;  %v4168_v36 = vand.u32 4294901760, %v4099_v30 }
 0x18a   : > { %v4169_v40 = vsub.f32 %v4099_v30, %v4168_v36 }
 0x18c   : > { %v4170_v43 = vand.u32 4294901760, %v4169_v40 }
 0x18e   : > { %2800 = vmatmul.mubr.f32.vlgmr.msra.gmra.mrb[0].mxu0 %v2713_v17 }
 0x18f   : > { %2811 = vmatpush1.msra.mxu0 %v2731_v21  ;;  %2874 = vmatprep.mubr.f32.mxu0 %v9381_v0  ;;  %v4086_v21 = vpop.permute.xlu1 %4085 }
 0x190   : > { %2884 = vmatprep.subr.mxu0 %v2646_v11  ;;  %v4088_v29 = vsel %vm4087_vm14, %v4084_v22, %v4086_v21 }
 0x191   : > { %v4094_v32 = vsel %vm9583_vm9, %v4088_v29, 0.0 }
 0x192   : > { %v4103_v37 = vand.u32 4294901760, %v4094_v32 }
 0x194   : > { %v4186_v41 = vsub.f32 %v4094_v32, %v4103_v37 }
 0x196   : > { %2877 = vmatmul.mubr.f32.vlgmr.msra.gmra.mrb[0].mxu0 %v2714_v20 }
 0x197   : > { %2886 = vmatpush1.msra.mxu0 %v2648_v18  ;;  %2949 = vmatprep.mubr.f32.mxu0 %v9381_v0 }
 0x198   : > { %2962 = vmatprep.subr.mxu0 %v2726_v19 }
 0x19e   : > { %2953 = vmatmul.mubr.f32.vlgmr.msra.gmra.mrb[0].mxu0 %v2715_v23 }
 0x19f   : > { %2966 = vmatpush1.msra.mxu0 %v2732_v24  ;;  %3029 = vmatprep.mubr.f32.mxu0 %v9381_v0  ;;  %v4089_v24 = vsel %vm4087_vm14, %v4086_v21, %v4084_v22 }
 0x1a0   : > { %3038 = vmatprep.subr.mxu0 %v2646_v11  ;;  %v3684_v11 = vsub.f32 %v3614_v5, %v3683_v7  ;;  %v4095_v25 = vsel %vm9726_vm12, %v4089_v24, 0.0 }
 0x1a1   : > { %v4101_v26 = vand.u32 4294901760, %v4095_v25 }
 0x1a2   : > { %v3685_v14 = vand.u32 4294901760, %v3684_v11 }
 0x1a3   : > { %v4180_v33 = vsub.f32 %v4095_v25, %v4101_v26 }
 0x1a6   : > { %3031 = vmatmul.mubr.f32.vlgmr.msra.gmra.mrb[0].mxu0 %v2713_v17 }
 0x1a7   : > { %3040 = vmatpush1.msra.mxu0 %v2648_v18  ;;  %3103 = vmatprep.mubr.f32.mxu0 %v9381_v0  ;;  %v3703_v18 = vsub.f32 %v3701_v12, %v3702_v15 }
 0x1a8   : > { %3132 = vmatprep.subr.mxu0 %v3131_v39 }
 0x1a9   : > { %v3704_v20 = vand.u32 4294901760, %v3703_v18  ;;  %v9027_v18 = vld [vmem:[%s10000_s2 + $0x8] sm:$0xff] }
 0x1ae   : > { %3105 = vmatmul.mubr.f32.vlgmr.msra.gmra.mrb[0].mxu0 %v2713_v17  ;;  %v3686_v17 = vsub.f32 %v3684_v11, %v3685_v14 }
 0x1af   : > { %3134 = vmatpush1.msra.mxu0 %v3133_v46  ;;  %3197 = vmatprep.mubr.f32.mxu0 %v9381_v0 }
 0x1b0   : > { %3214 = vmatprep.subr.mxu0 %v3213_v53  ;;  %v3687_v19 = vand.u32 4294901760, %v3686_v17  ;;  %v9754_v53 = vld [vmem:[%s10001_s3] sm:$0xff] }
 0x1b6   : > { %3203 = vmatmul.mubr.f32.vlgmr.msra.gmra.mrb[0].mxu0 %v3202_v56 }
 0x1b7   : > { %3220 = vmatpush1.msra.mxu0 %v3219_v57  ;;  %3283 = vmatprep.mubr.f32.mxu0 %v9381_v0 }
 0x1b8   : > { %3293 = vmatprep.subr.mxu0 %v3210_v44  ;;  %v4187_v44 = vand.u32 4294901760, %v4186_v41 }
 0x1be   : > { %3285 = vmatmul.mubr.f32.vlgmr.msra.gmra.mrb[0].mxu0 %v3198_v45 }
 0x1bf   : > { %3296 = vmatpush1.msra.mxu0 %v3216_v49  ;;  %3359 = vmatprep.mubr.f32.mxu0 %v9381_v0 }
 0x1c0   : > { %3369 = vmatprep.subr.mxu0 %v3131_v39 }
 0x1c6   : > { %3362 = vmatmul.mubr.f32.vlgmr.msra.gmra.mrb[0].mxu0 %v3199_v48 }
 0x1c7   : > { %3371 = vmatpush1.msra.mxu0 %v3133_v46  ;;  %3434 = vmatprep.mubr.f32.mxu0 %v9381_v0 }
 0x1c8   : > { %3447 = vmatprep.subr.mxu0 %v3211_v47  ;;  %v4188_v47 = vsub.f32 %v4186_v41, %v4187_v44 }
 0x1ca   : > { %v4189_v49 = vand.u32 4294901760, %v4188_v47 }
 0x1ce   : > { %3438 = vmatmul.mubr.f32.vlgmr.msra.gmra.mrb[0].mxu0 %v3200_v51 }
 0x1cf   : > { %3451 = vmatpush1.msra.mxu0 %v3217_v52  ;;  %3514 = vmatprep.mubr.f32.mxu0 %v9381_v0 }
 0x1d0   : > { %3523 = vmatprep.subr.mxu0 %v3131_v39  ;;  %v4181_v39 = vand.u32 4294901760, %v4180_v33 }
 0x1d2   : > { %v4182_v42 = vsub.f32 %v4180_v33, %v4181_v39 }
 0x1d6   : > { %3516 = vmatmul.mubr.f32.vlgmr.msra.gmra.mrb[0].mxu0 %v3198_v45 }
 0x1d7   : > { %3525 = vmatpush1.msra.mxu0 %v3133_v46  ;;  %3588 = vmatprep.mubr.f32.mxu0 %v9381_v0  ;;  %v4171_v46 = vsub.f32 %v4169_v40, %v4170_v43 }
 0x1d8   : > { %3617 = vmatprep.subr.mxu0 %v3616_v4 }
 0x1d9   : > { %v4172_v48 = vand.u32 4294901760, %v4171_v46 }
 0x1de   : > { %3590 = vmatmul.mubr.f32.vlgmr.msra.gmra.mrb[0].mxu0 %v3198_v45  ;;  %v4183_v45 = vand.u32 4294901760, %v4182_v42 }
 0x1df   : > { %3619 = vmatpush1.msra.mxu0 %v3618_v9  ;;  %3682 = vmatprep.mubr.f32.mxu0 %v9381_v0 }
 0x1e0   : > { %3699 = vmatprep.subr.mxu0 %v3698_v16 }
 0x1e6   : > { %3688 = vmatmul.mubr.f32.vlgmr.msra.gmra.mrb[0].mxu0 %v3687_v19  ;;  %v4619_v19 = vsel %vm249_vm0, %v9027_v18, 0 }
 0x1e7   : > { %3705 = vmatpush1.msra.mxu0 %v3704_v20  ;;  %3768 = vmatprep.mubr.f32.mxu0 %v9381_v0  ;;  %v4688_v20 = vand.u32 4294901760, %v4619_v19 }
 0x1e8   : > { %3778 = vmatprep.subr.mxu0 %v3695_v1 }
 0x1e9   : > { %v4689_v21 = vsub.f32 %v4619_v19, %v4688_v20 }
 0x1eb   : > { %v4690_v22 = vand.u32 4294901760, %v4689_v21 }
 0x1ed   : > { %v4691_v25 = vsub.f32 %v4689_v21, %v4690_v22 }
 0x1ee   : > { %3770 = vmatmul.mubr.f32.vlgmr.msra.gmra.mrb[0].mxu0 %v3683_v7 }
 0x1ef   : > { %3781 = vmatpush1.msra.mxu0 %v3701_v12  ;;  %3844 = vmatprep.mubr.f32.mxu0 %v9381_v0 }
 0x1f0   : > { %3854 = vmatprep.subr.mxu0 %v3616_v4 }
 0x1f6   : > { %3847 = vmatmul.mubr.f32.vlgmr.msra.gmra.mrb[0].mxu0 %v3684_v11 }
 0x1f7   : > { %3856 = vmatpush1.msra.mxu0 %v3618_v9  ;;  %3919 = vmatprep.mubr.f32.mxu0 %v9381_v0 }
 0x1f8   : > { %3932 = vmatprep.subr.mxu0 %v3696_v10 }
 0x1fe   : > { %3923 = vmatmul.mubr.f32.vlgmr.msra.gmra.mrb[0].mxu0 %v3685_v14 }
 0x1ff   : > { %3936 = vmatpush1.msra.mxu0 %v3702_v15  ;;  %3999 = vmatprep.mubr.f32.mxu0 %v9381_v0 }
 0x200   : > { %4008 = vmatprep.subr.mxu0 %v3616_v4 }
 0x206   : > { %4001 = vmatmul.mubr.f32.vlgmr.msra.gmra.mrb[0].mxu0 %v3683_v7 }
 0x207   : > { %4010 = vmatpush1.msra.mxu0 %v3618_v9  ;;  %4073 = vmatprep.mubr.f32.mxu0 %v9381_v0 }
 0x208   : > { %4102 = vmatprep.subr.mxu0 %v4101_v26 }
 0x20e   : > { %4075 = vmatmul.mubr.f32.vlgmr.msra.gmra.mrb[0].mxu0 %v3683_v7 }
 0x20f   : > { %4104 = vmatpush1.msra.mxu0 %v4103_v37  ;;  %4167 = vmatprep.mubr.f32.mxu0 %v9381_v0 }
 0x210   : > { %4184 = vmatprep.subr.mxu0 %v4183_v45 }
 0x216   : > { %4173 = vmatmul.mubr.f32.vlgmr.msra.gmra.mrb[0].mxu0 %v4172_v48 }
 0x217   : > { %4190 = vmatpush1.msra.mxu0 %v4189_v49  ;;  %4253 = vmatprep.mubr.f32.mxu0 %v9381_v0 }
 0x218   : > { %4263 = vmatprep.subr.mxu0 %v4180_v33  ;;  %v4692_v33 = vand.u32 4294901760, %v4691_v25 }
 0x21e   : > { %4255 = vmatmul.mubr.f32.vlgmr.msra.gmra.mrb[0].mxu0 %v4168_v36 }
 0x21f   : > { %4266 = vmatpush1.msra.mxu0 %v4186_v41  ;;  %4329 = vmatprep.mubr.f32.mxu0 %v9381_v0 }
 0x220   : > { %4339 = vmatprep.subr.mxu0 %v4101_v26 }
 0x226   : > { %4332 = vmatmul.mubr.f32.vlgmr.msra.gmra.mrb[0].mxu0 %v4169_v40 }
 0x227   : > { %4341 = vmatpush1.msra.mxu0 %v4103_v37  ;;  %4404 = vmatprep.mubr.f32.mxu0 %v9381_v0 }
 0x228   : > { %4417 = vmatprep.subr.mxu0 %v4181_v39 }
 0x22e   : > { %4408 = vmatmul.mubr.f32.vlgmr.msra.gmra.mrb[0].mxu0 %v4170_v43 }
 0x22f   : > { %4421 = vmatpush1.msra.mxu0 %v4187_v44  ;;  %4484 = vmatprep.mubr.f32.mxu0 %v9381_v0 }
 0x230   : > { %4493 = vmatprep.subr.mxu0 %v4101_v26 }
 0x236   : > { %4486 = vmatmul.mubr.f32.vlgmr.msra.gmra.mrb[0].mxu0 %v4168_v36 }
 0x237   : > { %4495 = vmatpush1.msra.mxu0 %v4103_v37  ;;  %4558 = vmatprep.mubr.f32.mxu0 %v9381_v0 }
 0x23e   : > { %4560 = vmatmul.mubr.f32.vlgmr.msra.gmra.mrb[0].mxu0 %v4168_v36 }
 0x311   : > { %v4561_v50 = vpop.f32.mrb[0].mxu0 }
 0x312   : > { %v4563_v51 = vpop.f32.mrb[1].mxu0 }
 0x313   : > { %v4568_v52 = vadd.f32 %v4563_v51, %v4561_v50 }
 0x315   : > { %4569 = vadd.xlane.f32.xlu0 %v4568_v52 }
 0x32b   : > { %4586 = vperm.xlu0 %9306, %v9754_v53  }
 0x3a2   : > { %v4570_v56 = vpop.xlane.xlu0 %4569 }
 0x3a3   : > { %v4571_v57 = vmul.f32 0.00390625, %v4570_v56 }
 0x3a5   : > { %v4572_v59 = vsub.f32 %v4561_v50, %v4571_v57  ;;  %v4573_v60 = vsub.f32 %v4563_v51, %v4571_v57  ;;  %v4607_v50 = vld [vmem:[%s10000_s2] sm:$0xff] }
 0x3a6   : > { %v5087_v54 = vsel %vm249_vm0, %v4607_v50, 0 }
 0x3a7   : > { %v4574_v62 = vmul.f32 %v4572_v59, %v4572_v59  ;;  %v4575_v63 = vmul.f32 %v4573_v60, %v4573_v60  ;;  %v5156_v57 = vand.u32 4294901760, %v5087_v54 }
 0x3a9   : > { %v4576_v4 = vadd.f32 %v4575_v63, %v4574_v62  ;;  %v5157_v62 = vsub.f32 %v5087_v54, %v5156_v57 }
 0x3aa   : > { %v4587_v7 = vpop.permute.xlu0 %4586 }
 0x3ab   : > { %4577 = vadd.xlane.f32.xlu1 %v4576_v4 }
 0x3bc   : > { %4592 = vperm.xlu1 %9307, %v9754_v53  }
 0x438   : > { %v4578_v2 = vpop.xlane.xlu1 %4577 }
 0x439   : > { %v4579_v5 = vmul.f32 0.00390625, %v4578_v2  ;;  %v5158_v2 = vand.u32 4294901760, %v5157_v62 }
 0x43b   : > { %v4580_v6 = vadd.f32 1e-05, %v4579_v5 }
 0x43c   : > { %v4593_v11 = vpop.permute.xlu1 %4592 }
 0x43d   : > { %9311 = vrsqrt.f32 %v4580_v6 }
 0x447   : > { %v9312_v1 = vpop.eup %9311 }
 0x448   : > { %v4582_v9 = vmul.f32 %v9312_v1, %v4572_v59  ;;  %v4583_v10 = vmul.f32 %v9312_v1, %v4573_v60  ;;  %v5159_v1 = vsub.f32 %v5157_v62, %v5158_v2 }
 0x44a   : > { %v4589_v12 = vmul.f32 %v4587_v7, %v4582_v9  ;;  %v4590_v13 = vmul.f32 %v4587_v7, %v4583_v10  ;;  %v5160_v7 = vand.u32 4294901760, %v5159_v1 }
 0x44c   : > { %v4595_v14 = vadd.f32 %v4593_v11, %v4589_v12  ;;  %v4596_v15 = vadd.f32 %v4593_v11, %v4590_v13 }
 0x44e   : > { %v9758_v16 = vmax.f32 %v4595_v14, 0.0  ;;  %v9764_v17 = vmax.f32 %v4596_v15, 0.0  ;;  %v9028_v14 = vld [vmem:[%s10000_s2 + $0x10] sm:$0xff] }
 0x44f   : > { %v5565_v19 = vsel %vm249_vm0, %v9028_v14, 0 }
 0x450   : > { %6034 = vrot.lane.b32.xlu0 %v9758_v16, %s9385_s9  ;;  %4608 = vrot.lane.b32.xlu1 %v9758_v16, %s9382_s6 }
 0x454   : > { %6986 = vrot.lane.b32.xlu0 %v9758_v16, %s9386_s12  ;;  %4610 = vrot.lane.b32.xlu1 %v9764_v17, %s9382_s6 }
 0x458   : > { %7466 = vrot.lane.b32.xlu0 %v9758_v16, %s9387_s20  ;;  %4599 = vrot.lane.b32.xlu1 %v9758_v16, %s9383_s7 }
 0x45c   : > { %7946 = vrot.lane.b32.xlu0 %v9758_v16, %s9388_s27  ;;  %4601 = vrot.lane.b32.xlu1 %v9764_v17, %s9383_s7 }
 0x460   : > { %8426 = vrot.lane.b32.xlu0 %v9758_v16, %s9389_s30  ;;  %5554 = vrot.lane.b32.xlu1 %v9758_v16, %s9384_s8 }
 0x464   : > { %5556 = vrot.lane.b32.xlu1 %v9764_v17, %s9384_s8  ;;  %s188_s8 = sand.u32 1, %s9371_s16  }
 0x468   : > { %6036 = vrot.lane.b32.xlu1 %v9764_v17, %s9385_s9  ;;  %s9016_s9 = sshll.u32 %s188_s8, 4 }
 0x46c   : > { %6988 = vrot.lane.b32.xlu1 %v9764_v17, %s9386_s12  ;;  %s9041_s12 = sshll.u32 %s9441_s19, 8  ;;  %s8939_s19 = scalar_lea.sflag [#allocation3], %s188_s8 }
 0x46d   : > { %s9956_s23 = scalar_lea.hbm %s10002_s4, %s9041_s12 }
 0x470   : > { %7468 = vrot.lane.b32.xlu1 %v9764_v17, %s9387_s20  ;;  %s190_s20 = scalar_lea.vmem [#allocation2], %s9016_s9 }
 0x474   : > { %7948 = vrot.lane.b32.xlu1 %v9764_v17, %s9388_s27  ;;  %s8953_s27 = sshll.u32 %s190_s20, 4  ;;  %s9958_s27 = int_to_ptr.vmem [resolvable:$true] %s8953_s27 }
 0x475   : > { %s9317_s28 = scalar_lea.vmem %s9958_s27, 256 }
 0x476   : > { %p9318_p11 = scmp.ne.s32.totalorder %s9958_s27, %s9317_s28 }
 0x478   : > { %8428 = vrot.lane.b32.xlu1 %v9764_v17, %s9389_s30  ;;  %p9319_p12 = pnand %p9318_p11, %p9458_p5 }
 0x47a   : > { %p9320_p13 = pneg %p9319_p12 }
 0x4c2   : > { %v4609_v24 = vpop.permute.xlu1 %4608 }
 0x4c6   : > { %v4611_v26 = vpop.permute.xlu1 %4610 }
 0x4c7   : > { %v4612_v27 = vsel %vm238_vm1, %v4609_v24, %v4611_v26  ;;  %v4613_v29 = vsel %vm238_vm1, %v4611_v26, %v4609_v24  ;;  %vm10024_vm1 = vcmp.lt.s32.totalorder %v9510_v8, 127 }
 0x4c8   : > { %v4614_v30 = vsel %vm203_vm2, %v4613_v29, 0.0  ;;  %v4621_v32 = vand.u32 4294901760, %v4612_v27  ;;  %vm10025_vm2 = vmmov %vm10024_vm1 }
 0x4c9   : > { %v4623_v36 = vand.u32 4294901760, %v4614_v30 }
 0x4ca   : > { %v4700_v37 = vsub.f32 %v4612_v27, %v4621_v32  ;;  %4622 = vmatprep.subr.mxu1 %v4621_v32  ;;  %v4600_v46 = vpop.permute.xlu1 %4599 }
 0x4cb   : > { %v4706_v39 = vsub.f32 %v4614_v30, %v4623_v36  ;;  %4624 = vmatpush1.msra.mxu1 %v4623_v36 }
 0x4cc   : > { %4693 = vmatmul.mubr.f32.vlgmr.msra.gmra.mrb[0].mxu1 %v4692_v33  ;;  %v4701_v40 = vand.u32 4294901760, %v4700_v37 }
 0x4cd   : > { %v4707_v41 = vand.u32 4294901760, %v4706_v39  ;;  %4773 = vmatprep.mubr.f32.mxu1 %v9381_v0 }
 0x4ce   : > { %v4702_v42 = vsub.f32 %v4700_v37, %v4701_v40  ;;  %v4602_v47 = vpop.permute.xlu1 %4601 }
 0x4cf   : > { %v4708_v43 = vsub.f32 %v4706_v39, %v4707_v41  ;;  %v4603_v48 = vsel %vm224_vm3, %v4600_v46, %v4602_v47  ;;  %v4604_v52 = vsel %vm224_vm3, %v4602_v47, %v4600_v46  ;;  %vm10026_vm3 = vcmp.lt.s32.totalorder %v9510_v8, 113 }
 0x4d0   : > { %v4703_v44 = vand.u32 4294901760, %v4702_v42  ;;  %v4606_v49 = vsel %vm9528_vm4, %v4603_v48, 0.0  ;;  %v4605_v55 = vsel %vm9550_vm6, %v4604_v52, 0.0 }
 0x4d1   : > { %v4709_v45 = vand.u32 4294901760, %v4708_v43  ;;  %v5089_v51 = vand.u32 4294901760, %v4606_v49  ;;  %v5091_v59 = vand.u32 4294901760, %v4605_v55 }
 0x4d2   : > { %4704 = vmatprep.subr.mxu1 %v4703_v44  ;;  %v5555_v10 = vpop.permute.xlu1 %5554  ;;  %v9029_v44 = vld [vmem:[%s10000_s2 + $0x18] sm:$0xff] }
 0x4d3   : > { %4710 = vmatpush1.msra.mxu1 %v4709_v45  ;;  %v5168_v56 = vsub.f32 %v4606_v49, %v5089_v51  ;;  %v5174_v63 = vsub.f32 %v4605_v55, %v5091_v59  ;;  %v6045_v47 = vsel %vm249_vm0, %v9029_v44, 0 }
 0x4d4   : > { %4775 = vmatmul.mubr.f32.vlgmr.msra.gmra.mrb[0].mxu1 %v4688_v20  ;;  %4783 = vmatprep.subr.mxu1 %v4700_v37  ;;  %v6114_v49 = vand.u32 4294901760, %v6045_v47 }
 0x4d5   : > { %4786 = vmatpush1.msra.mxu1 %v4706_v39  ;;  %4849 = vmatprep.mubr.f32.mxu1 %v9381_v0  ;;  %v5169_v60 = vand.u32 4294901760, %v5168_v56  ;;  %v5175_v5 = vand.u32 4294901760, %v5174_v63 }
 0x4d6   : > { %4859 = vmatprep.subr.mxu1 %v4621_v32  ;;  %v5557_v11 = vpop.permute.xlu1 %5556  ;;  %v6115_v52 = vsub.f32 %v6045_v47, %v6114_v49 }
 0x4d7   : > { %v5170_v4 = vsub.f32 %v5168_v56, %v5169_v60  ;;  %v5176_v38 = vsub.f32 %v5174_v63, %v5175_v5  ;;  %v5558_v12 = vsel %vm1190_vm7, %v5555_v10, %v5557_v11  ;;  %v5559_v18 = vsel %vm1190_vm7, %v5557_v11, %v5555_v10 }
 0x4d8   : > { %v5561_v13 = vsel %vm9574_vm8, %v5558_v12, 0.0 }
 0x4d9   : > { %v5171_v6 = vand.u32 4294901760, %v5170_v4  ;;  %v5177_v9 = vand.u32 4294901760, %v5176_v38  ;;  %v5567_v15 = vand.u32 4294901760, %v5561_v13 }
 0x4dc   : > { %4852 = vmatmul.mubr.f32.vlgmr.msra.gmra.mrb[0].mxu1 %v4689_v21  ;;  %v5646_v21 = vsub.f32 %v5561_v13, %v5567_v15 }
 0x4dd   : > { %4861 = vmatpush1.msra.mxu1 %v4623_v36  ;;  %4924 = vmatprep.mubr.f32.mxu1 %v9381_v0 }
 0x4de   : > { %4937 = vmatprep.subr.mxu1 %v4701_v40  ;;  %v5647_v25 = vand.u32 4294901760, %v5646_v21  ;;  %v6037_v40 = vpop.permute.xlu1 %6036 }
 0x4e0   : > { %v5648_v29 = vsub.f32 %v5646_v21, %v5647_v25 }
 0x4e2   : > { %v5649_v33 = vand.u32 4294901760, %v5648_v29 }
 0x4e4   : > { %4928 = vmatmul.mubr.f32.vlgmr.msra.gmra.mrb[0].mxu1 %v4690_v22  ;;  %v5634_v22 = vand.u32 4294901760, %v5565_v19 }
 0x4e5   : > { %4941 = vmatpush1.msra.mxu1 %v4707_v41  ;;  %5004 = vmatprep.mubr.f32.mxu1 %v9381_v0  ;;  %v6035_v41 = vpop.permute.xlu0 %6034 }
 0x4e6   : > { %5013 = vmatprep.subr.mxu1 %v4621_v32  ;;  %v5635_v26 = vsub.f32 %v5565_v19, %v5634_v22  ;;  %v6038_v42 = vsel %vm1675_vm11, %v6035_v41, %v6037_v40  ;;  %v6039_v46 = vsel %vm1675_vm11, %v6037_v40, %v6035_v41 }
 0x4e7   : > { %v6041_v43 = vsel %vm9528_vm4, %v6038_v42, 0.0  ;;  %v6040_v48 = vsel %vm9538_vm5, %v6039_v46, 0.0  ;;  %vm10027_vm4 = vmmov %vm10026_vm3 }
 0x4e8   : > { %v5636_v30 = vand.u32 4294901760, %v5635_v26  ;;  %v6047_v45 = vand.u32 4294901760, %v6041_v43  ;;  %v6049_v50 = vand.u32 4294901760, %v6040_v48 }
 0x4ea   : > { %v6126_v31 = vsub.f32 %v6041_v43, %v6047_v45  ;;  %v6132_v54 = vsub.f32 %v6040_v48, %v6049_v50 }
 0x4ec   : > { %5006 = vmatmul.mubr.f32.vlgmr.msra.gmra.mrb[0].mxu1 %v4688_v20 }
 0x4ed   : > { %5015 = vmatpush1.msra.mxu1 %v4623_v36  ;;  %5078 = vmatprep.mubr.f32.mxu1 %v9381_v0  ;;  %v5637_v36 = vsub.f32 %v5635_v26, %v5636_v30 }
 0x4ee   : > { %5090 = vmatprep.subr.mxu1 %v5089_v51 }
 0x4ef   : > { %v5638_v37 = vand.u32 4294901760, %v5637_v36 }
 0x4f4   : > { %5080 = vmatmul.mubr.f32.vlgmr.msra.gmra.mrb[0].mxu1 %v4688_v20  ;;  %v5560_v20 = vsel %vm9594_vm10, %v5559_v18, 0.0 }
 0x4f5   : > { %5092 = vmatpush1.msra.mxu1 %v5091_v59  ;;  %5155 = vmatprep.mubr.f32.mxu1 %v9381_v0  ;;  %v5569_v24 = vand.u32 4294901760, %v5560_v20 }
 0x4f6   : > { %5172 = vmatprep.subr.mxu1 %v5171_v6 }
 0x4f7   : > { %v5652_v27 = vsub.f32 %v5560_v20, %v5569_v24 }
 0x4f9   : > { %v5653_v32 = vand.u32 4294901760, %v5652_v27 }
 0x4fb   : > { %v5654_v3 = vsub.f32 %v5652_v27, %v5653_v32 }
 0x4fc   : > { %5161 = vmatmul.mubr.f32.vlgmr.msra.gmra.mrb[0].mxu1 %v5160_v7  ;;  %v6521_v7 = vand.u32 4294901760, %v9758_v16 }
 0x4fd   : > { %5178 = vmatpush1.msra.mxu1 %v5177_v9  ;;  %5241 = vmatprep.mubr.f32.mxu1 %v9381_v0  ;;  %v5655_v39 = vand.u32 4294901760, %v5654_v3 }
 0x4fe   : > { %5251 = vmatprep.subr.mxu1 %v5168_v56  ;;  %v6116_v56 = vand.u32 4294901760, %v6115_v52  ;;  %v6604_v11 = vsub.f32 %v9758_v16, %v6521_v7  ;;  %v6989_v16 = vpop.permute.xlu1 %6988 }
 0x500   : > { %v6605_v14 = vand.u32 4294901760, %v6604_v11 }
 0x502   : > { %v7469_v47 = vpop.permute.xlu1 %7468 }
 0x504   : > { %5243 = vmatmul.mubr.f32.vlgmr.msra.gmra.mrb[0].mxu1 %v5156_v57 }
 0x505   : > { %5254 = vmatpush1.msra.mxu1 %v5174_v63  ;;  %5317 = vmatprep.mubr.f32.mxu1 %v9381_v0 }
 0x506   : > { %5327 = vmatprep.subr.mxu1 %v5089_v51 }
 0x50c   : > { %5320 = vmatmul.mubr.f32.vlgmr.msra.gmra.mrb[0].mxu1 %v5157_v62 }
 0x50d   : > { %5329 = vmatpush1.msra.mxu1 %v5091_v59  ;;  %5392 = vmatprep.mubr.f32.mxu1 %v9381_v0 }
 0x50e   : > { %5405 = vmatprep.subr.mxu1 %v5169_v60  ;;  %v6117_v60 = vsub.f32 %v6115_v52, %v6116_v56 }
 0x510   : > { %v6118_v63 = vand.u32 4294901760, %v6117_v60 }
 0x514   : > { %5396 = vmatmul.mubr.f32.vlgmr.msra.gmra.mrb[0].mxu1 %v5158_v2  ;;  %v9030_v2 = vld [vmem:[%s10000_s2 + $0x20] sm:$0xff] }
 0x515   : > { %5409 = vmatpush1.msra.mxu1 %v5175_v5  ;;  %5472 = vmatprep.mubr.f32.mxu1 %v9381_v0  ;;  %v6519_v5 = vand.u32 4294901760, %v9764_v17  ;;  %v6517_v6 = vsel %vm249_vm0, %v9030_v2, 0 }
 0x516   : > { %5481 = vmatprep.subr.mxu1 %v5089_v51  ;;  %v6127_v51 = vand.u32 4294901760, %v6126_v31  ;;  %v6586_v38 = vand.u32 4294901760, %v6517_v6 }
 0x517   : > { %v6598_v1 = vsub.f32 %v9764_v17, %v6519_v5  ;;  %v6606_v17 = vsub.f32 %v6604_v11, %v6605_v14 }
 0x518   : > { %v6128_v55 = vsub.f32 %v6126_v31, %v6127_v51  ;;  %v6587_v10 = vsub.f32 %v6517_v6, %v6586_v38 }
 0x519   : > { %v6599_v9 = vand.u32 4294901760, %v6598_v1  ;;  %v6607_v20 = vand.u32 4294901760, %v6606_v17 }
 0x51a   : > { %v6588_v13 = vand.u32 4294901760, %v6587_v10 }
 0x51b   : > { %v6600_v12 = vsub.f32 %v6598_v1, %v6599_v9 }
 0x51c   : > { %5474 = vmatmul.mubr.f32.vlgmr.msra.gmra.mrb[0].mxu1 %v5156_v57  ;;  %v6589_v18 = vsub.f32 %v6587_v10, %v6588_v13 }
 0x51d   : > { %5483 = vmatpush1.msra.mxu1 %v5091_v59  ;;  %5546 = vmatprep.mubr.f32.mxu1 %v9381_v0  ;;  %v6129_v59 = vand.u32 4294901760, %v6128_v55 }
 0x51e   : > { %5568 = vmatprep.subr.mxu1 %v5567_v15  ;;  %v6590_v19 = vand.u32 4294901760, %v6589_v18 }
 0x524   : > { %5548 = vmatmul.mubr.f32.vlgmr.msra.gmra.mrb[0].mxu1 %v5156_v57  ;;  %v6133_v57 = vand.u32 4294901760, %v6132_v54 }
 0x525   : > { %5570 = vmatpush1.msra.mxu1 %v5569_v24  ;;  %5633 = vmatprep.mubr.f32.mxu1 %v9381_v0 }
 0x526   : > { %5650 = vmatprep.subr.mxu1 %v5649_v33  ;;  %v6134_v62 = vsub.f32 %v6132_v54, %v6133_v57 }
 0x528   : > { %v6135_v4 = vand.u32 4294901760, %v6134_v62 }
 0x52c   : > { %5639 = vmatmul.mubr.f32.vlgmr.msra.gmra.mrb[0].mxu1 %v5638_v37 }
 0x52d   : > { %5656 = vmatpush1.msra.mxu1 %v5655_v39  ;;  %5719 = vmatprep.mubr.f32.mxu1 %v9381_v0 }
 0x52e   : > { %5729 = vmatprep.subr.mxu1 %v5646_v21  ;;  %v6987_v21 = vpop.permute.xlu0 %6986 }
 0x532   : > { %v7467_v48 = vpop.permute.xlu0 %7466 }
 0x534   : > { %5721 = vmatmul.mubr.f32.vlgmr.msra.gmra.mrb[0].mxu1 %v5634_v22 }
 0x535   : > { %5732 = vmatpush1.msra.mxu1 %v5652_v27  ;;  %5795 = vmatprep.mubr.f32.mxu1 %v9381_v0  ;;  %v6990_v27 = vsel %vm10025_vm2, %v6987_v21, %v6989_v16 }
 0x536   : > { %5805 = vmatprep.subr.mxu1 %v5567_v15 }
 0x53c   : > { %5798 = vmatmul.mubr.f32.vlgmr.msra.gmra.mrb[0].mxu1 %v5635_v26 }
 0x53d   : > { %5807 = vmatpush1.msra.mxu1 %v5569_v24  ;;  %5870 = vmatprep.mubr.f32.mxu1 %v9381_v0 }
 0x53e   : > { %5883 = vmatprep.subr.mxu1 %v5647_v25  ;;  %v9031_v25 = vld [vmem:[%s10000_s2 + $0x28] sm:$0xff] }
 0x53f   : > { %v6997_v29 = vsel %vm249_vm0, %v9031_v25, 0 }
 0x544   : > { %5874 = vmatmul.mubr.f32.vlgmr.msra.gmra.mrb[0].mxu1 %v5636_v30  ;;  %v6992_v30 = vsel %vm9583_vm9, %v6990_v27, 0.0 }
 0x545   : > { %5887 = vmatpush1.msra.mxu1 %v5653_v32  ;;  %5950 = vmatprep.mubr.f32.mxu1 %v9381_v0  ;;  %v7066_v32 = vand.u32 4294901760, %v6997_v29  ;;  %v7001_v33 = vand.u32 4294901760, %v6992_v30 }
 0x546   : > { %5959 = vmatprep.subr.mxu1 %v5567_v15  ;;  %v6601_v15 = vand.u32 4294901760, %v6600_v12  ;;  %v9033_v12 = vld [vmem:[%s10000_s2 + $0x38] sm:$0xff] }
 0x547   : > { %v7067_v3 = vsub.f32 %v6997_v29, %v7066_v32  ;;  %v7084_v37 = vsub.f32 %v6992_v30, %v7001_v33 }
 0x549   : > { %v7068_v40 = vand.u32 4294901760, %v7067_v3  ;;  %v7085_v41 = vand.u32 4294901760, %v7084_v37 }
 0x54b   : > { %v7069_v43 = vsub.f32 %v7067_v3, %v7068_v40  ;;  %v7086_v44 = vsub.f32 %v7084_v37, %v7085_v41 }
 0x54c   : > { %5952 = vmatmul.mubr.f32.vlgmr.msra.gmra.mrb[0].mxu1 %v5634_v22 }
 0x54d   : > { %5961 = vmatpush1.msra.mxu1 %v5569_v24  ;;  %6024 = vmatprep.mubr.f32.mxu1 %v9381_v0  ;;  %v7087_v46 = vand.u32 4294901760, %v7086_v44 }
 0x54e   : > { %6048 = vmatprep.subr.mxu1 %v6047_v45 }
 0x554   : > { %6026 = vmatmul.mubr.f32.vlgmr.msra.gmra.mrb[0].mxu1 %v5634_v22  ;;  %v6991_v22 = vsel %vm10024_vm1, %v6989_v16, %v6987_v21 }
 0x555   : > { %6050 = vmatpush1.msra.mxu1 %v6049_v50  ;;  %6113 = vmatprep.mubr.f32.mxu1 %v9381_v0  ;;  %v6993_v24 = vsel %vm9574_vm8, %v6991_v22, 0.0 }
 0x556   : > { %6130 = vmatprep.subr.mxu1 %v6129_v59  ;;  %v6999_v26 = vand.u32 4294901760, %v6993_v24 }
 0x558   : > { %v7078_v58 = vsub.f32 %v6993_v24, %v6999_v26 }
 0x55a   : > { %v7079_v36 = vand.u32 4294901760, %v7078_v58 }
 0x55c   : > { %6119 = vmatmul.mubr.f32.vlgmr.msra.gmra.mrb[0].mxu1 %v6118_v63  ;;  %v7080_v39 = vsub.f32 %v7078_v58, %v7079_v36 }
 0x55d   : > { %6136 = vmatpush1.msra.mxu1 %v6135_v4  ;;  %6199 = vmatprep.mubr.f32.mxu1 %v9381_v0 }
 0x55e   : > { %6209 = vmatprep.subr.mxu1 %v6126_v31  ;;  %v7081_v42 = vand.u32 4294901760, %v7080_v39  ;;  %v7471_v31 = vsel %vm10026_vm3, %v7469_v47, %v7467_v48 }
 0x564   : > { %6201 = vmatmul.mubr.f32.vlgmr.msra.gmra.mrb[0].mxu1 %v6114_v49 }
 0x565   : > { %6212 = vmatpush1.msra.mxu1 %v6132_v54  ;;  %6275 = vmatprep.mubr.f32.mxu1 %v9381_v0 }
 0x566   : > { %6285 = vmatprep.subr.mxu1 %v6047_v45 }
 0x56c   : > { %6278 = vmatmul.mubr.f32.vlgmr.msra.gmra.mrb[0].mxu1 %v6115_v52  ;;  %v7470_v52 = vsel %vm10027_vm4, %v7467_v48, %v7469_v47 }
 0x56d   : > { %6287 = vmatpush1.msra.mxu1 %v6049_v50  ;;  %6350 = vmatprep.mubr.f32.mxu1 %v9381_v0  ;;  %v7472_v55 = vsel %vm9538_vm5, %v7470_v52, 0.0  ;;  %vm10028_vm5 = vcmp.lt.s32.totalorder %v9510_v8, 112 }
 0x56e   : > { %6363 = vmatprep.subr.mxu1 %v6127_v51  ;;  %vm10029_vm6 = vmmov %vm10028_vm5 }
 0x574   : > { %6354 = vmatmul.mubr.f32.vlgmr.msra.gmra.mrb[0].mxu1 %v6116_v56 }
 0x575   : > { %6367 = vmatpush1.msra.mxu1 %v6133_v57  ;;  %6430 = vmatprep.mubr.f32.mxu1 %v9381_v0  ;;  %v7481_v57 = vand.u32 4294901760, %v7472_v55 }
 0x576   : > { %6439 = vmatprep.subr.mxu1 %v6047_v45  ;;  %v7070_v45 = vand.u32 4294901760, %v7069_v43 }
 0x577   : > { %v7564_v62 = vsub.f32 %v7472_v55, %v7481_v57 }
 0x579   : > { %v7565_v2 = vand.u32 4294901760, %v7564_v62 }
 0x57b   : > { %v7566_v35 = vsub.f32 %v7564_v62, %v7565_v2 }
 0x57c   : > { %6432 = vmatmul.mubr.f32.vlgmr.msra.gmra.mrb[0].mxu1 %v6114_v49 }
 0x57d   : > { %6441 = vmatpush1.msra.mxu1 %v6049_v50  ;;  %6504 = vmatprep.mubr.f32.mxu1 %v9381_v0  ;;  %v9032_v50 = vld [vmem:[%s10000_s2 + $0x30] sm:$0xff] }
 0x57e   : > { %6520 = vmatprep.subr.mxu1 %v6519_v5  ;;  %v7477_v54 = vsel %vm249_vm0, %v9032_v50, 0 }
 0x57f   : > { %v7546_v56 = vand.u32 4294901760, %v7477_v54 }
 0x581   : > { %v7547_v60 = vsub.f32 %v7477_v54, %v7546_v56 }
 0x583   : > { %v7548_v4 = vand.u32 4294901760, %v7547_v60 }
 0x584   : > { %6506 = vmatmul.mubr.f32.vlgmr.msra.gmra.mrb[0].mxu1 %v6114_v49  ;;  %v7473_v49 = vsel %vm9682_vm15, %v7471_v31, 0.0 }
 0x585   : > { %6522 = vmatpush1.msra.mxu1 %v6521_v7  ;;  %6585 = vmatprep.mubr.f32.mxu1 %v9381_v0  ;;  %v7479_v51 = vand.u32 4294901760, %v7473_v49  ;;  %v7549_v6 = vsub.f32 %v7547_v60, %v7548_v4 }
 0x586   : > { %6602 = vmatprep.subr.mxu1 %v6601_v15 }
 0x587   : > { %v7558_v34 = vsub.f32 %v7473_v49, %v7479_v51 }
 0x589   : > { %v7559_v59 = vand.u32 4294901760, %v7558_v34 }
 0x58b   : > { %v7560_v63 = vsub.f32 %v7558_v34, %v7559_v59 }
 0x58c   : > { %6591 = vmatmul.mubr.f32.vlgmr.msra.gmra.mrb[0].mxu1 %v6590_v19 }
 0x58d   : > { %6608 = vmatpush1.msra.mxu1 %v6607_v20  ;;  %6671 = vmatprep.mubr.f32.mxu1 %v9381_v0 }
 0x58e   : > { %6681 = vmatprep.subr.mxu1 %v6598_v1  ;;  %v7550_v1 = vand.u32 4294901760, %v7549_v6 }
 0x594   : > { %6673 = vmatmul.mubr.f32.vlgmr.msra.gmra.mrb[0].mxu1 %v6586_v38 }
 0x595   : > { %6684 = vmatpush1.msra.mxu1 %v6604_v11  ;;  %6747 = vmatprep.mubr.f32.mxu1 %v9381_v0 }
 0x596   : > { %6757 = vmatprep.subr.mxu1 %v6519_v5 }
 0x59c   : > { %6750 = vmatmul.mubr.f32.vlgmr.msra.gmra.mrb[0].mxu1 %v6587_v10 }
 0x59d   : > { %6759 = vmatpush1.msra.mxu1 %v6521_v7  ;;  %6822 = vmatprep.mubr.f32.mxu1 %v9381_v0 }
 0x59e   : > { %6835 = vmatprep.subr.mxu1 %v6599_v9  ;;  %v7947_v9 = vpop.permute.xlu0 %7946 }
 0x5a4   : > { %6826 = vmatmul.mubr.f32.vlgmr.msra.gmra.mrb[0].mxu1 %v6588_v13 }
 0x5a5   : > { %6839 = vmatpush1.msra.mxu1 %v6605_v14  ;;  %6902 = vmatprep.mubr.f32.mxu1 %v9381_v0  ;;  %v7957_v14 = vsel %vm249_vm0, %v9033_v12, 0 }
 0x5a6   : > { %6911 = vmatprep.subr.mxu1 %v6519_v5  ;;  %v7561_v5 = vand.u32 4294901760, %v7560_v63  ;;  %v8026_v17 = vand.u32 4294901760, %v7957_v14 }
 0x5a8   : > { %v8027_v20 = vsub.f32 %v7957_v14, %v8026_v17 }
 0x5aa   : > { %v8028_v22 = vand.u32 4294901760, %v8027_v20 }
 0x5ac   : > { %6904 = vmatmul.mubr.f32.vlgmr.msra.gmra.mrb[0].mxu1 %v6586_v38 }
 0x5ad   : > { %6913 = vmatpush1.msra.mxu1 %v6521_v7  ;;  %6976 = vmatprep.mubr.f32.mxu1 %v9381_v0  ;;  %v7949_v7 = vpop.permute.xlu1 %7948 }
 0x5ae   : > { %7000 = vmatprep.subr.mxu1 %v6999_v26  ;;  %v7951_v10 = vsel %vm10028_vm5, %v7949_v7, %v7947_v9  ;;  %v7950_v15 = vsel %vm10029_vm6, %v7947_v9, %v7949_v7 }
 0x5af   : > { %v7953_v11 = vsel %vm214_vm13, %v7951_v10, 0.0  ;;  %v7961_v19 = vand.u32 4294901760, %v7950_v15 }
 0x5b0   : > { %v7959_v13 = vand.u32 4294901760, %v7953_v11 }
 0x5b1   : > { %v8044_v16 = vsub.f32 %v7950_v15, %v7961_v19  ;;  %v9316_v15 = vld [vmem:[%s9475_s5 + $0x8] sm:$0xff] }
 0x5b2   : > { %v8038_v18 = vsub.f32 %v7953_v11, %v7959_v13 }
 0x5b3   : > { %v8045_v24 = vand.u32 4294901760, %v8044_v16 }
 0x5b4   : > { %6978 = vmatmul.mubr.f32.vlgmr.msra.gmra.mrb[0].mxu1 %v6586_v38  ;;  %v7567_v38 = vand.u32 4294901760, %v7566_v35  ;;  %v8039_v28 = vand.u32 4294901760, %v8038_v18 }
 0x5b5   : > { %7002 = vmatpush1.msra.mxu1 %v7001_v33  ;;  %7065 = vmatprep.mubr.f32.mxu1 %v9381_v0  ;;  %v8046_v27 = vsub.f32 %v8044_v16, %v8045_v24 }
 0x5b6   : > { %7082 = vmatprep.subr.mxu1 %v7081_v42  ;;  %v8040_v21 = vsub.f32 %v8038_v18, %v8039_v28 }
 0x5b7   : > { %v8047_v30 = vand.u32 4294901760, %v8046_v27 }
 0x5b8   : > { %v8041_v25 = vand.u32 4294901760, %v8040_v21 }
 0x5bc   : > { %7071 = vmatmul.mubr.f32.vlgmr.msra.gmra.mrb[0].mxu1 %v7070_v45 }
 0x5bd   : > { %7088 = vmatpush1.msra.mxu1 %v7087_v46  ;;  %7151 = vmatprep.mubr.f32.mxu1 %v9381_v0 }
 0x5be   : > { %7161 = vmatprep.subr.mxu1 %v7078_v58  ;;  %v8429_v58 = vpop.permute.xlu1 %8428 }
 0x5c4   : > { %7153 = vmatmul.mubr.f32.vlgmr.msra.gmra.mrb[0].mxu1 %v7066_v32 }
 0x5c5   : > { %7164 = vmatpush1.msra.mxu1 %v7084_v37  ;;  %7227 = vmatprep.mubr.f32.mxu1 %v9381_v0 }
 0x5c6   : > { %7237 = vmatprep.subr.mxu1 %v6999_v26 }
 0x5cc   : > { %7230 = vmatmul.mubr.f32.vlgmr.msra.gmra.mrb[0].mxu1 %v7067_v3  ;;  %v9034_v3 = vld [vmem:[%s10000_s2 + $0x40] sm:$0xff] }
 0x5cd   : > { %7239 = vmatpush1.msra.mxu1 %v7001_v33  ;;  %7302 = vmatprep.mubr.f32.mxu1 %v9381_v0 }
 0x5ce   : > { %7315 = vmatprep.subr.mxu1 %v7079_v36 }
 0x5d4   : > { %7306 = vmatmul.mubr.f32.vlgmr.msra.gmra.mrb[0].mxu1 %v7068_v40  ;;  %v8437_v40 = vsel %vm249_vm0, %v9034_v3, 0 }
 0x5d5   : > { %7319 = vmatpush1.msra.mxu1 %v7085_v41  ;;  %7382 = vmatprep.mubr.f32.mxu1 %v9381_v0  ;;  %v8506_v42 = vand.u32 4294901760, %v8437_v40 }
 0x5d6   : > { %7391 = vmatprep.subr.mxu1 %v6999_v26  ;;  %v8029_v26 = vsub.f32 %v8027_v20, %v8028_v22 }
 0x5d7   : > { %v8507_v45 = vsub.f32 %v8437_v40, %v8506_v42 }
 0x5d8   : > { %v8030_v29 = vand.u32 4294901760, %v8029_v26 }
 0x5d9   : > { %v8508_v47 = vand.u32 4294901760, %v8507_v45 }
 0x5db   : > { %v8509_v49 = vsub.f32 %v8507_v45, %v8508_v47 }
 0x5dc   : > { %7384 = vmatmul.mubr.f32.vlgmr.msra.gmra.mrb[0].mxu1 %v7066_v32 }
 0x5dd   : > { %7393 = vmatpush1.msra.mxu1 %v7001_v33  ;;  %7456 = vmatprep.mubr.f32.mxu1 %v9381_v0  ;;  %v8510_v50 = vand.u32 4294901760, %v8509_v49 }
 0x5de   : > { %7480 = vmatprep.subr.mxu1 %v7479_v51 }
 0x5e4   : > { %7458 = vmatmul.mubr.f32.vlgmr.msra.gmra.mrb[0].mxu1 %v7066_v32  ;;  %v8427_v32 = vpop.permute.xlu0 %8426 }
 0x5e5   : > { %7482 = vmatpush1.msra.mxu1 %v7481_v57  ;;  %7545 = vmatprep.mubr.f32.mxu1 %v9381_v0  ;;  %v8431_v33 = vsel %vm4087_vm14, %v8429_v58, %v8427_v32  ;;  %v8430_v39 = vsel %vm4087_vm14, %v8427_v32, %v8429_v58 }
 0x5e6   : > { %7562 = vmatprep.subr.mxu1 %v7561_v5  ;;  %v8433_v36 = vsel %vm9726_vm12, %v8431_v33, 0.0  ;;  %v8432_v41 = vsel %vm9583_vm9, %v8430_v39, 0.0 }
 0x5e7   : > { %v8439_v37 = vand.u32 4294901760, %v8433_v36  ;;  %v8441_v43 = vand.u32 4294901760, %v8432_v41 }
 0x5e9   : > { %v8518_v23 = vsub.f32 %v8433_v36, %v8439_v37  ;;  %v8524_v8 = vsub.f32 %v8432_v41, %v8441_v43 }
 0x5eb   : > { %v8519_v44 = vand.u32 4294901760, %v8518_v23  ;;  %v8525_v48 = vand.u32 4294901760, %v8524_v8 }
 0x5ec   : > { %7551 = vmatmul.mubr.f32.vlgmr.msra.gmra.mrb[0].mxu1 %v7550_v1 }
 0x5ed   : > { %7568 = vmatpush1.msra.mxu1 %v7567_v38  ;;  %7631 = vmatprep.mubr.f32.mxu1 %v9381_v0  ;;  %v8520_v46 = vsub.f32 %v8518_v23, %v8519_v44  ;;  %v8526_v61 = vsub.f32 %v8524_v8, %v8525_v48 }
 0x5ee   : > { %7641 = vmatprep.subr.mxu1 %v7558_v34  ;;  %v9392_v34 = vmov 2  }
 0x5ef   : > { %v8521_v31 = vand.u32 4294901760, %v8520_v46  ;;  %9308 = vset.pattern.permute.xlu0 %v9392_v34 }
 0x5f4   : > { %7633 = vmatmul.mubr.f32.vlgmr.msra.gmra.mrb[0].mxu1 %v7546_v56 }
 0x5f5   : > { %7644 = vmatpush1.msra.mxu1 %v7564_v62  ;;  %7707 = vmatprep.mubr.f32.mxu1 %v9381_v0 }
 0x5f6   : > { %7717 = vmatprep.subr.mxu1 %v7479_v51 }
 0x5fc   : > { %7710 = vmatmul.mubr.f32.vlgmr.msra.gmra.mrb[0].mxu1 %v7547_v60 }
 0x5fd   : > { %7719 = vmatpush1.msra.mxu1 %v7481_v57  ;;  %7782 = vmatprep.mubr.f32.mxu1 %v9381_v0 }
 0x5fe   : > { %7795 = vmatprep.subr.mxu1 %v7559_v59 }
 0x604   : > { %7786 = vmatmul.mubr.f32.vlgmr.msra.gmra.mrb[0].mxu1 %v7548_v4 }
 0x605   : > { %7799 = vmatpush1.msra.mxu1 %v7565_v2  ;;  %7862 = vmatprep.mubr.f32.mxu1 %v9381_v0 }
 0x606   : > { %7871 = vmatprep.subr.mxu1 %v7479_v51  ;;  %v8527_v51 = vand.u32 4294901760, %v8526_v61 }
 0x60c   : > { %7864 = vmatmul.mubr.f32.vlgmr.msra.gmra.mrb[0].mxu1 %v7546_v56 }
 0x60d   : > { %7873 = vmatpush1.msra.mxu1 %v7481_v57  ;;  %7936 = vmatprep.mubr.f32.mxu1 %v9381_v0 }
 0x60e   : > { %7960 = vmatprep.subr.mxu1 %v7959_v13 }
 0x614   : > { %7938 = vmatmul.mubr.f32.vlgmr.msra.gmra.mrb[0].mxu1 %v7546_v56  ;;  %v9393_v56 = vmov 3  }
 0x615   : > { %7962 = vmatpush1.msra.mxu1 %v7961_v19  ;;  %8025 = vmatprep.mubr.f32.mxu1 %v9381_v0 }
 0x616   : > { %8042 = vmatprep.subr.mxu1 %v8041_v25  ;;  %9309 = vset.pattern.permute.xlu1 %v9393_v56 }
 0x61c   : > { %8031 = vmatmul.mubr.f32.vlgmr.msra.gmra.mrb[0].mxu1 %v8030_v29 }
 0x61d   : > { %8048 = vmatpush1.msra.mxu1 %v8047_v30  ;;  %8111 = vmatprep.mubr.f32.mxu1 %v9381_v0 }
 0x61e   : > { %8121 = vmatprep.subr.mxu1 %v8038_v18 }
 0x624   : > { %8113 = vmatmul.mubr.f32.vlgmr.msra.gmra.mrb[0].mxu1 %v8026_v17 }
 0x625   : > { %8124 = vmatpush1.msra.mxu1 %v8044_v16  ;;  %8187 = vmatprep.mubr.f32.mxu1 %v9381_v0 }
 0x626   : > { %8197 = vmatprep.subr.mxu1 %v7959_v13 }
 0x62c   : > { %8190 = vmatmul.mubr.f32.vlgmr.msra.gmra.mrb[0].mxu1 %v8027_v20 }
 0x62d   : > { %8199 = vmatpush1.msra.mxu1 %v7961_v19  ;;  %8262 = vmatprep.mubr.f32.mxu1 %v9381_v0 }
 0x62e   : > { %8275 = vmatprep.subr.mxu1 %v8039_v28 }
 0x634   : > { %8266 = vmatmul.mubr.f32.vlgmr.msra.gmra.mrb[0].mxu1 %v8028_v22 }
 0x635   : > { %8279 = vmatpush1.msra.mxu1 %v8045_v24  ;;  %8342 = vmatprep.mubr.f32.mxu1 %v9381_v0 }
 0x636   : > { %8351 = vmatprep.subr.mxu1 %v7959_v13  ;;  %v9315_v13 = vld [vmem:[%s9475_s5] sm:$0xff]  ;;  %s9394_s5 = smov [#allocation2]  }
 0x637   : > { %s9321_s29 = sshll.u32 %s9394_s5, 4  ;;  %s9322_s29 = int_to_ptr.vmem [resolvable:$false] %s9321_s29 }
 0x638   : > { %s9323_s10 = scalar_lea.vmem %s9322_s29, 512  ;;  %p9324_p0 = scmp.lt.s32.totalorder %s9958_s27, %s9322_s29 }
 0x639   : > { %p9325_p1 = scmp.lt.s32.totalorder %s9323_s10, %s9317_s28 }
 0x63b   : > { %p9326_p2 = por %p9325_p1, %p9324_p0 }
 0x63c   : > { %8344 = vmatmul.mubr.f32.vlgmr.msra.gmra.mrb[0].mxu1 %v8026_v17 }
 0x63d   : > { %8353 = vmatpush1.msra.mxu1 %v7961_v19  ;;  %8416 = vmatprep.mubr.f32.mxu1 %v9381_v0  ;;  %p9327_p3 = pnand %p9326_p2, %p9320_p13 }
 0x63e   : > { %8440 = vmatprep.subr.mxu1 %v8439_v37 }
 0x644   : > { %8418 = vmatmul.mubr.f32.vlgmr.msra.gmra.mrb[0].mxu1 %v8026_v17 }
 0x645   : > { %8442 = vmatpush1.msra.mxu1 %v8441_v43  ;;  %8505 = vmatprep.mubr.f32.mxu1 %v9381_v0 }
 0x646   : > { %8522 = vmatprep.subr.mxu1 %v8521_v31 }
 0x64c   : > { %8511 = vmatmul.mubr.f32.vlgmr.msra.gmra.mrb[0].mxu1 %v8510_v50 }
 0x64d   : > { %8528 = vmatpush1.msra.mxu1 %v8527_v51  ;;  %8591 = vmatprep.mubr.f32.mxu1 %v9381_v0 }
 0x64e   : > { %8601 = vmatprep.subr.mxu1 %v8518_v23 }
 0x654   : > { %8593 = vmatmul.mubr.f32.vlgmr.msra.gmra.mrb[0].mxu1 %v8506_v42 }
 0x655   : > { %8604 = vmatpush1.msra.mxu1 %v8524_v8  ;;  %8667 = vmatprep.mubr.f32.mxu1 %v9381_v0 }
 0x656   : > { %8677 = vmatprep.subr.mxu1 %v8439_v37 }
 0x65c   : > { %8670 = vmatmul.mubr.f32.vlgmr.msra.gmra.mrb[0].mxu1 %v8507_v45 }
 0x65d   : > { %8679 = vmatpush1.msra.mxu1 %v8441_v43  ;;  %8742 = vmatprep.mubr.f32.mxu1 %v9381_v0 }
 0x65e   : > { %8755 = vmatprep.subr.mxu1 %v8519_v44 }
 0x664   : > { %8746 = vmatmul.mubr.f32.vlgmr.msra.gmra.mrb[0].mxu1 %v8508_v47 }
 0x665   : > { %8759 = vmatpush1.msra.mxu1 %v8525_v48  ;;  %8822 = vmatprep.mubr.f32.mxu1 %v9381_v0 }
 0x666   : > { %8831 = vmatprep.subr.mxu1 %v8439_v37 }
 0x66c   : > { %8824 = vmatmul.mubr.f32.vlgmr.msra.gmra.mrb[0].mxu1 %v8506_v42 }
 0x66d   : > { %8833 = vmatpush1.msra.mxu1 %v8441_v43  ;;  %8896 = vmatprep.mubr.f32.mxu1 %v9381_v0 }
 0x674   : > { %8898 = vmatmul.mubr.f32.vlgmr.msra.gmra.mrb[0].mxu1 %v8506_v42 }
 0x747   : > { %v8899_v52 = vpop.f32.mrb[0].mxu1 }
 0x748   : > { %v8901_v54 = vpop.f32.mrb[1].mxu1 }
 0x749   : > { %v8906_v55 = vadd.f32 %v8901_v54, %v8899_v52 }
 0x74b   : > { %8907 = vadd.xlane.f32.xlu0 %v8906_v55 }
 0x761   : > { %8923 = vperm.xlu0 %9308, %v9754_v53  }
 0x765   : > { %9310 = vset.pattern.permute.xlu0 %v9393_v56 }
 0x7d8   : > { %v8908_v57 = vpop.xlane.xlu0 %8907 }
 0x7d9   : > { %v8909_v59 = vmul.f32 0.00390625, %v8908_v57 }
 0x7db   : > { %v8910_v60 = vsub.f32 %v8899_v52, %v8909_v59  ;;  %v8911_v62 = vsub.f32 %v8901_v54, %v8909_v59 }
 0x7dd   : > { %v8912_v63 = vmul.f32 %v8910_v60, %v8910_v60  ;;  %v8913_v4 = vmul.f32 %v8911_v62, %v8911_v62 }
 0x7df   : > { %v8914_v0 = vadd.f32 %v8913_v4, %v8912_v63 }
 0x7e0   : > { %v8924_v1 = vpop.permute.xlu0 %8923 }
 0x7e1   : > { %8915 = vadd.xlane.f32.xlu1 %v8914_v0 }
 0x7f2   : > { %8929 = vperm.xlu1 %9309, %v9754_v53  }
 0x86e   : > { %v8916_v2 = vpop.xlane.xlu1 %8915 }
 0x86f   : > { %v8917_v5 = vmul.f32 0.00390625, %v8916_v2 }
 0x871   : > { %v8918_v6 = vadd.f32 1e-05, %v8917_v5 }
 0x872   : > { %v8930_v9 = vpop.permute.xlu1 %8929 }
 0x873   : > { %9313 = vrsqrt.f32 %v8918_v6 }
 0x87d   : > { %v9314_v35 = vpop.eup %9313 }
 0x87e   : > { %v8920_v38 = vmul.f32 %v9314_v35, %v8910_v60  ;;  %v8921_v7 = vmul.f32 %v9314_v35, %v8911_v62 }
 0x880   : > { %v8926_v10 = vmul.f32 %v8924_v1, %v8920_v38  ;;  %v8927_v11 = vmul.f32 %v8924_v1, %v8921_v7 }
 0x882   : > { %v8932_v53 = vadd.f32 %v8930_v9, %v8926_v10  ;;  %v8933_v12 = vadd.f32 %v8930_v9, %v8927_v11 }
 0x884   : > { %v8934_v14 = vadd.f32 %v9315_v13, %v8932_v53  ;;  %v8935_v18 = vadd.f32 %v9316_v15, %v8933_v12 }
 0x886   : > { %8936 = vst [vmem:[%s190_s20] sm:$0xff] %v8934_v14  ;;  %8937 = vst [vmem:[%s190_s20 + $0x8] sm:$0xff] %v8935_v18 }
 0x887   : > { %9330 = shalt.err (!%p9327_p3)
}
 0x888   : > { %s9331_s11 = scalar_lea.hbm %s9956_s23, 256  ;;  %s9335_s6 = scalar_lea.hbm %s10002_s4, 512 }
 0x889   : > { %p9332_p4 = scmp.ne.s32.totalorder %s9956_s23, %s9331_s11  ;;  %p9336_p9 = scmp.lt.u32.totalorder %s9956_s23, %s10002_s4 }
 0x88a   : > { %p9337_p10 = scmp.lt.u32.totalorder %s9335_s6, %s9331_s11  ;;  %p9339_p12 = scmp.lt.u32.totalorder %s9331_s11, %s9956_s23 }
 0x88b   : > { %p9333_p7 = pnand %p9332_p4, %p9458_p5 }
 0x88c   : > { %p9338_p11 = por %p9337_p10, %p9336_p9 }
 0x88d   : > { %p9334_p8 = pneg %p9333_p7 }
 0x88e   : > { %p9340_p13 = por %p9339_p12, %p9338_p11 }
 0x890   : > { %p9341_p0 = pnand %p9340_p13, %p9334_p8 }
 0x892   : > { %9344 = shalt.err (!%p9341_p0)
}
 0x893   : > { %9254 = dma.vmem_to_hbm [thread:$0]  (%p9458_p5), %s9958_s27, 256, %s9956_s23, %s8939_s19  }
 0x894 PF: > { %p9260_p1 = scmp.ge.s32.totalorder %s9379_s18, 2  ;;  %s8965_s9 = sand.u32 1, %s9367_s15  }
 0x895   : > { %s8966_s12 = scalar_lea.sflag [#allocation3], %s8965_s9 }
 0x896   : > { %p9257_p2 = pnand %p9260_p1, %p9462_p6 }
 0x898   : > { %9362 = dma.done.wait (!%p9257_p2), %s8966_s12, 256  }
 0x899   : > { %9364 = vsyncadd (!%p9257_p2), %s8966_s12, 4294967040  ;;  %p14_p3 = scmp.ge.s32.totalorder %s9445_s21, 4   ;;  %s10030_s15 = smov %s9371_s16 }
 0x89a   : > { %s10031_s16 = smov %s9375_s17  ;;  %s10032_s17 = smov %s9456_s24 }
 0x89b   : > { %s10033_s18 = smov %s9445_s21  ;;  %16 = sbr.rel (!%p14_p3) target bundleno = 3 (0x3), region = 87 }
 0x8a2   :  { %8971 = vsyncpa [#allocation3], 1 }
 0x8a3   :  { %8973 = vsyncpa [#allocation3 + $0x1], 1 }

</bundles_post_ra>
